<compile_context>
chip_gen: v7x
topology: tpu7x:2x2x1
jax: 0.10.0
libtpu: 0.0.40
codegen_flags: <defaults>
</compile_context>

<pallas_src>
import functools
import math

import jax
import jax.numpy as jnp
from jax.experimental import pallas as pl
from jax.experimental.pallas import tpu as pltpu

KSIZE = 7
PAD = 3  # padding = 3 for kernel_size 7 (matches the PyTorch module)


def _spatial_attention_kernel(b_ref, x_ref, o_ref, *, num_channels):
    """b_ref: (2*DHW, TN) bf16 band; x_ref: (NB, C, DHW) f32; o_ref: (NB, TN) f32."""
    x0 = x_ref[:, 0, :]
    s = x0
    m = x0
    for c in range(1, num_channels):            # short unrolled channel reduce (C small)
        xc = x_ref[:, c, :]
        s = s + xc
        m = jnp.maximum(m, xc)
    # LHS = [channel-sum | channel-max]; 1/C is already folded into the band's avg half.
    lhs = jnp.concatenate([s.astype(jnp.bfloat16), m.astype(jnp.bfloat16)], axis=-1)
    acc = jnp.dot(lhs, b_ref[...], preferred_element_type=jnp.float32)
    o_ref[...] = jax.nn.sigmoid(acc)


def _build_band(weight, C, D, H, W):
    """(1,2,K,K,K) Conv3d weight -> (2*DHW, DHW) bf16 stacked band.

    Rows [0:DHW] are the avg-channel weights scaled by 1/C (so the kernel can use
    the channel SUM as its LHS); rows [DHW:2*DHW] are the max-channel weights.
    Zero padding is folded in via masking, and the orientation is
        band[(in spatial idx), (out spatial idx)] = w[in - out + PAD]
    so that  out = lhs @ band  reproduces the zero-padded cross-correlation.
    """
    w3 = weight[0].astype(jnp.float32)              # (2, K, K, K)
    dd, hh, ww = jnp.arange(D), jnp.arange(H), jnp.arange(W)
    kd = dd[:, None] - dd[None, :] + PAD            # (D_in, D_out)
    kh = hh[:, None] - hh[None, :] + PAD            # (H_in, H_out)
    kw = ww[:, None] - ww[None, :] + PAD            # (W_in, W_out)
    vd = (kd >= 0) & (kd < KSIZE)
    vh = (kh >= 0) & (kh < KSIZE)
    vw = (kw >= 0) & (kw < KSIZE)
    kd_i = jnp.clip(kd, 0, KSIZE - 1)[:, None, None, :, None, None]
    kh_i = jnp.clip(kh, 0, KSIZE - 1)[None, :, None, None, :, None]
    kw_i = jnp.clip(kw, 0, KSIZE - 1)[None, None, :, None, None, :]
    band = w3[:, kd_i, kh_i, kw_i]                  # (2, D, H, W, D, H, W)
    mask = (vd[:, None, None, :, None, None]
            & vh[None, :, None, None, :, None]
            & vw[None, None, :, None, None, :])
    band = jnp.where(mask[None], band, 0.0)
    DHW = D * H * W
    band = band.reshape(2, DHW, DHW)
    scale = jnp.array([1.0 / C, 1.0], dtype=jnp.float32)   # fold 1/C into avg half
    band = band * scale[:, None, None]
    return band.reshape(2 * DHW, DHW).astype(jnp.bfloat16)


def _pick_tn(DHW):
    """Output-lane tile: full DHW when small, else a 128-multiple divisor."""
    if DHW <= 1024:
        return DHW
    for tn in (1024, 512, 256, 128):
        if DHW % tn == 0:
            return tn
    return DHW


def spatial_attention(x, weight):
    """x: (N, C, D, H, W) f32; weight: (1, 2, K, K, K) f32 (Conv3d OIDHW). -> (N, 1, D, H, W)."""
    N, C, D, H, W = x.shape
    DHW = D * H * W
    band = _build_band(weight, C, D, H, W)          # (2*DHW, DHW) bf16

    # Batch tile: fill the MXU M dim.  N <= 128 -> whole batch in one step
    # (block == full dim, so the (8,128) rule holds for any N).  Larger N is
    # padded to a multiple of 128 and the padded rows sliced off afterwards.
    if N <= 128:
        NB, N_pad = N, N
        x_p = x.reshape(N, C, DHW)
    else:
        NB = 128
        N_pad = pl.cdiv(N, NB) * NB
        x_p = jnp.pad(x.reshape(N, C, DHW), ((0, N_pad - N), (0, 0), (0, 0)))

    TN = _pick_tn(DHW)                # bounds band VMEM at 2*DHW*TN*dtype*bufs
    n_b = N_pad // NB
    n_j = DHW // TN
    band_resident = (n_j == 1)        # constant index_map -> single-buffer it

    # VMEM budget (bytes): band + double-buffered x block + double-buffered out
    # block + LHS/stat working set, with headroom.  Raise the scoped limit when
    # the estimate exceeds the defaults, but never past v7x's 64 MiB physical.
    band_bufs = 1 if band_resident else 2
    vmem_est = (2 * DHW * TN * 2 * band_bufs
                + NB * C * DHW * 4 * 2
                + NB * TN * 4 * 2
                + NB * 2 * DHW * (2 + 4)
                + (2 << 20))
    vmem_limit = int(min(max(vmem_est, 32 << 20), 64 << 20))

    cost = pl.CostEstimate(
        flops=4 * N_pad * DHW * DHW + 2 * N_pad * C * DHW,
        transcendentals=N_pad * DHW,
        bytes_accessed=2 * DHW * DHW * 2 * n_b + x_p.size * 4 + N_pad * DHW * 4)

    def make_call(single_buffer_band):
        if single_buffer_band:
            band_spec = pl.BlockSpec((2 * DHW, TN), lambda i, j: (0, j),
                                     pipeline_mode=pl.Buffered(1))
        else:
            band_spec = pl.BlockSpec((2 * DHW, TN), lambda i, j: (0, j))
        return pl.pallas_call(
            functools.partial(_spatial_attention_kernel, num_channels=C),
            out_shape=jax.ShapeDtypeStruct((N_pad, DHW), jnp.float32),
            grid_spec=pltpu.PrefetchScalarGridSpec(
                num_scalar_prefetch=0,
                grid=(n_b, n_j),
                in_specs=[
                    band_spec,                                      # conv weights (resident if n_j == 1)
                    pl.BlockSpec((NB, C, DHW), lambda i, j: (i, 0, 0)),
                ],
                out_specs=pl.BlockSpec((NB, TN), lambda i, j: (i, j)),
            ),
            compiler_params=pltpu.CompilerParams(
                dimension_semantics=("parallel", "parallel"),
                vmem_limit_bytes=vmem_limit),
            cost_estimate=cost,
        )

    if band_resident:
        try:
            out = make_call(True)(band, x_p)
        except Exception:
            # Fallback for Pallas versions without single-buffer pipeline_mode.
            out = make_call(False)(band, x_p)
    else:
        out = make_call(False)(band, x_p)

    return out[:N].reshape(N, 1, D, H, W)


def spatial_attention_ref(x, weight):
    """Pure-JAX (f32) reference of the PyTorch forward pass."""
    avg = jnp.mean(x, axis=1, keepdims=True)
    mx = jnp.max(x, axis=1, keepdims=True)
    cat = jnp.concatenate([avg, mx], axis=1)
    y = jax.lax.conv_general_dilated(
        cat, weight, window_strides=(1, 1, 1),
        padding=[(PAD, PAD)] * 3,
        dimension_numbers=('NCDHW', 'OIDHW', 'NCDHW'))
    return jax.nn.sigmoid(y)


if __name__ == "__main__":
    key = jax.random.PRNGKey(0)
    kx, kw = jax.random.split(key)

    # Small shapes implied by the module: 5-D NCDHW input for Conv3d(2->1, k=7).
    N, C, D, H, W = 2, 4, 8, 8, 8
    x = jax.random.normal(kx, (N, C, D, H, W), dtype=jnp.float32)

    # Deterministic Conv3d(2, 1, 7, bias=False) weight, kaiming-uniform-like bound.
    fan_in = 2 * KSIZE ** 3
    bound = 1.0 / math.sqrt(fan_in)
    weight = jax.random.uniform(kw, (1, 2, KSIZE, KSIZE, KSIZE),
                                dtype=jnp.float32, minval=-bound, maxval=bound)

    out = jax.block_until_ready(spatial_attention(x, weight))
    ref = spatial_attention_ref(x, weight)

    assert out.shape == (N, 1, D, H, W)
    # bf16 band / bf16 LHS with f32 accumulation; sigmoid-bounded outputs, so a
    # 5e-3 absolute tolerance comfortably covers the bf16 rounding (~1e-3 typ).
    max_err = float(jnp.max(jnp.abs(out - ref)))
    assert max_err < 5e-3, f"max abs error too large: {max_err}"
    print("KERNEL_OK")
</pallas_src>

<mosaic_0001>
module attributes {stable_mosaic.version = 11 : i64} {
  func.func @_spatial_attention_kernel(%arg0: i32, %arg1: i32, %arg2: memref<1024x512xbf16, #tpu.memory_space<vmem>>, %arg3: memref<2x4x512xf32, #tpu.memory_space<vmem>>, %arg4: memref<2x512xf32, #tpu.memory_space<vmem>>) attributes {dimension_semantics = [#tpu.dimension_semantics<parallel>, #tpu.dimension_semantics<parallel>], iteration_bounds = array<i64: 1, 1>, scalar_prefetch = 0 : i64, scratch_operands = 0 : i64, tpu.core_type = #tpu.core_type<tc>, window_params = [{pipeline_mode = #tpu.pipeline_mode<synchronous>, transform_indices = @transform_0, window_bounds = array<i64: 1024, 512>}, {transform_indices = @transform_1, window_bounds = array<i64: 2, 4, 512>}, {transform_indices = @transform_2, window_bounds = array<i64: 2, 512>}]} {
    %c0 = arith.constant 0 : index
    %c0_0 = arith.constant 0 : index
    %c0_1 = arith.constant 0 : index
    %0 = vector.load %arg3[%c0, %c0_0, %c0_1] : memref<2x4x512xf32, #tpu.memory_space<vmem>>, vector<2x1x512xf32>
    %1 = vector.shape_cast %0 : vector<2x1x512xf32> to vector<2x512xf32>
    %c0_2 = arith.constant 0 : index
    %c1 = arith.constant 1 : index
    %c0_3 = arith.constant 0 : index
    %2 = vector.load %arg3[%c0_2, %c1, %c0_3] : memref<2x4x512xf32, #tpu.memory_space<vmem>>, vector<2x1x512xf32>
    %3 = vector.shape_cast %2 : vector<2x1x512xf32> to vector<2x512xf32>
    %4 = arith.addf %1, %3 : vector<2x512xf32>
    %5 = arith.maximumf %1, %3 : vector<2x512xf32>
    %c0_4 = arith.constant 0 : index
    %c2 = arith.constant 2 : index
    %c0_5 = arith.constant 0 : index
    %6 = vector.load %arg3[%c0_4, %c2, %c0_5] : memref<2x4x512xf32, #tpu.memory_space<vmem>>, vector<2x1x512xf32>
    %7 = vector.shape_cast %6 : vector<2x1x512xf32> to vector<2x512xf32>
    %8 = arith.addf %4, %7 : vector<2x512xf32>
    %9 = arith.maximumf %5, %7 : vector<2x512xf32>
    %c0_6 = arith.constant 0 : index
    %c3 = arith.constant 3 : index
    %c0_7 = arith.constant 0 : index
    %10 = vector.load %arg3[%c0_6, %c3, %c0_7] : memref<2x4x512xf32, #tpu.memory_space<vmem>>, vector<2x1x512xf32>
    %11 = vector.shape_cast %10 : vector<2x1x512xf32> to vector<2x512xf32>
    %12 = arith.addf %8, %11 : vector<2x512xf32>
    %13 = arith.maximumf %9, %11 : vector<2x512xf32>
    %14 = arith.truncf %12 : vector<2x512xf32> to vector<2x512xbf16>
    %15 = arith.truncf %13 : vector<2x512xf32> to vector<2x512xbf16>
    %16 = tpu.concatenate %14, %15 in 1 : vector<2x512xbf16>, vector<2x512xbf16> -> vector<2x1024xbf16>
    %c0_8 = arith.constant 0 : index
    %c0_9 = arith.constant 0 : index
    %17 = vector.load %arg2[%c0_8, %c0_9] : memref<1024x512xbf16, #tpu.memory_space<vmem>>, vector<1024x512xbf16>
    %cst = arith.constant dense<0.000000e+00> : vector<2x512xf32>
    %18 = tpu.matmul %16, %17, %cst {dimension_numbers = #tpu.dot_dimension_numbers<[1], [0], [0], [1], [0, 0, 1, 1], [], []>} : vector<2x1024xbf16>, vector<1024x512xbf16>, vector<2x512xf32> -> vector<2x512xf32>
    %19 = arith.negf %18 : vector<2x512xf32>
    %20 = math.exp %19 : vector<2x512xf32>
    %cst_10 = arith.constant 1.000000e+00 : f32
    %21 = vector.broadcast %cst_10 : f32 to vector<2x512xf32>
    %22 = arith.addf %21, %20 : vector<2x512xf32>
    %23 = arith.divf %21, %22 : vector<2x512xf32>
    %c0_11 = arith.constant 0 : index
    %c0_12 = arith.constant 0 : index
    %24 = vector.load %arg4[%c0_11, %c0_12] : memref<2x512xf32, #tpu.memory_space<vmem>>, vector<2x512xf32>
    tpu.vector_store %arg4[%c0_11, %c0_12], %23 {strides = array<i32>} : memref<2x512xf32, #tpu.memory_space<vmem>>, vector<2x512xf32>,
    return
  }
  func.func @transform_0(%arg0: i32, %arg1: i32) -> (i32, i32) {
    %c0_i32 = arith.constant 0 : i32
    %c0_i32_0 = arith.constant 0 : i32
    return %c0_i32, %arg1 : i32, i32
  }
  func.func @transform_1(%arg0: i32, %arg1: i32) -> (i32, i32, i32) {
    %c0_i32 = arith.constant 0 : i32
    %c0_i32_0 = arith.constant 0 : i32
    %c0_i32_1 = arith.constant 0 : i32
    return %arg0, %c0_i32, %c0_i32_0 : i32, i32, i32
  }
  func.func @transform_2(%arg0: i32, %arg1: i32) -> (i32, i32) {
    %c0_i32 = arith.constant 0 : i32
    return %arg0, %arg1 : i32, i32
  }
}

module attributes {stable_mosaic.version = 11 : i64} {
  func.func @_spatial_attention_kernel(%arg0: i32, %arg1: i32, %arg2: memref<1024x512xbf16, #tpu.memory_space<vmem>>, %arg3: memref<2x4x512xf32, #tpu.memory_space<vmem>>, %arg4: memref<2x512xf32, #tpu.memory_space<vmem>>) attributes {dimension_semantics = [#tpu.dimension_semantics<parallel>, #tpu.dimension_semantics<parallel>], iteration_bounds = array<i64: 1, 1>, scalar_prefetch = 0 : i64, scratch_operands = 0 : i64, tpu.core_type = #tpu.core_type<tc>, window_params = [{transform_indices = @transform_0, window_bounds = array<i64: 1024, 512>}, {transform_indices = @transform_1, window_bounds = array<i64: 2, 4, 512>}, {transform_indices = @transform_2, window_bounds = array<i64: 2, 512>}]} {
    %c0 = arith.constant 0 : index
    %c0_0 = arith.constant 0 : index
    %c0_1 = arith.constant 0 : index
    %0 = vector.load %arg3[%c0, %c0_0, %c0_1] : memref<2x4x512xf32, #tpu.memory_space<vmem>>, vector<2x1x512xf32>
    %1 = vector.shape_cast %0 : vector<2x1x512xf32> to vector<2x512xf32>
    %c0_2 = arith.constant 0 : index
    %c1 = arith.constant 1 : index
    %c0_3 = arith.constant 0 : index
    %2 = vector.load %arg3[%c0_2, %c1, %c0_3] : memref<2x4x512xf32, #tpu.memory_space<vmem>>, vector<2x1x512xf32>
    %3 = vector.shape_cast %2 : vector<2x1x512xf32> to vector<2x512xf32>
    %4 = arith.addf %1, %3 : vector<2x512xf32>
    %5 = arith.maximumf %1, %3 : vector<2x512xf32>
    %c0_4 = arith.constant 0 : index
    %c2 = arith.constant 2 : index
    %c0_5 = arith.constant 0 : index
    %6 = vector.load %arg3[%c0_4, %c2, %c0_5] : memref<2x4x512xf32, #tpu.memory_space<vmem>>, vector<2x1x512xf32>
    %7 = vector.shape_cast %6 : vector<2x1x512xf32> to vector<2x512xf32>
    %8 = arith.addf %4, %7 : vector<2x512xf32>
    %9 = arith.maximumf %5, %7 : vector<2x512xf32>
    %c0_6 = arith.constant 0 : index
    %c3 = arith.constant 3 : index
    %c0_7 = arith.constant 0 : index
    %10 = vector.load %arg3[%c0_6, %c3, %c0_7] : memref<2x4x512xf32, #tpu.memory_space<vmem>>, vector<2x1x512xf32>
    %11 = vector.shape_cast %10 : vector<2x1x512xf32> to vector<2x512xf32>
    %12 = arith.addf %8, %11 : vector<2x512xf32>
    %13 = arith.maximumf %9, %11 : vector<2x512xf32>
    %14 = arith.truncf %12 : vector<2x512xf32> to vector<2x512xbf16>
    %15 = arith.truncf %13 : vector<2x512xf32> to vector<2x512xbf16>
    %16 = tpu.concatenate %14, %15 in 1 : vector<2x512xbf16>, vector<2x512xbf16> -> vector<2x1024xbf16>
    %c0_8 = arith.constant 0 : index
    %c0_9 = arith.constant 0 : index
    %17 = vector.load %arg2[%c0_8, %c0_9] : memref<1024x512xbf16, #tpu.memory_space<vmem>>, vector<1024x512xbf16>
    %cst = arith.constant dense<0.000000e+00> : vector<2x512xf32>
    %18 = tpu.matmul %16, %17, %cst {dimension_numbers = #tpu.dot_dimension_numbers<[1], [0], [0], [1], [0, 0, 1, 1], [], []>} : vector<2x1024xbf16>, vector<1024x512xbf16>, vector<2x512xf32> -> vector<2x512xf32>
    %19 = arith.negf %18 : vector<2x512xf32>
    %20 = math.exp %19 : vector<2x512xf32>
    %cst_10 = arith.constant 1.000000e+00 : f32
    %21 = vector.broadcast %cst_10 : f32 to vector<2x512xf32>
    %22 = arith.addf %21, %20 : vector<2x512xf32>
    %23 = arith.divf %21, %22 : vector<2x512xf32>
    %c0_11 = arith.constant 0 : index
    %c0_12 = arith.constant 0 : index
    %24 = vector.load %arg4[%c0_11, %c0_12] : memref<2x512xf32, #tpu.memory_space<vmem>>, vector<2x512xf32>
    tpu.vector_store %arg4[%c0_11, %c0_12], %23 {strides = array<i32>} : memref<2x512xf32, #tpu.memory_space<vmem>>, vector<2x512xf32>,
    return
  }
  func.func @transform_0(%arg0: i32, %arg1: i32) -> (i32, i32) {
    %c0_i32 = arith.constant 0 : i32
    %c0_i32_0 = arith.constant 0 : i32
    return %c0_i32, %arg1 : i32, i32
  }
  func.func @transform_1(%arg0: i32, %arg1: i32) -> (i32, i32, i32) {
    %c0_i32 = arith.constant 0 : i32
    %c0_i32_0 = arith.constant 0 : i32
    %c0_i32_1 = arith.constant 0 : i32
    return %arg0, %c0_i32, %c0_i32_0 : i32, i32, i32
  }
  func.func @transform_2(%arg0: i32, %arg1: i32) -> (i32, i32) {
    %c0_i32 = arith.constant 0 : i32
    return %arg0, %arg1 : i32, i32
  }
}

</mosaic_0001>

<bundles_post_ra>
// kernel: tpu_custom_call.1
= control target key start
LH: loop header
LB: loop body
LE: loop exit
PB: predicated region body
PF: predicated region fallthrough
CT: control target
= control target key end

     0   :  { %7 = vsyncpa [#allocation3], 0  ;;  %s3049_s0 = inlined_call_operand.hbm [shape: bf16[1024,512], index: 0, kind: input, shape index: {}]   ;;  %s3050_s1 = inlined_call_operand.hbm [shape: f32[2,4,512], index: 1, kind: input, shape index: {}]   ;;  %s3051_s2 = inlined_call_operand.hbm [shape: f32[2,512], index: 2, kind: output, shape index: {}]  }
   0x1   :  { %8 = vsyncpa [#allocation6], 0 }
   0x2   :  { %9 = vsyncpa [#allocation4], 0  ;;  %s2921_s9 = smov [#allocation2]   ;;  %s2849_s13 = scalar_lea.hbm %s3049_s0, 32768 }
   0x3   :  { %s15_s10 = sshll.u32 %s2921_s9, 4  ;;  %p2850_p0 = scmp.ne.s32.totalorder %s3049_s0, %s2849_s13  ;;  %s16_s10 = int_to_ptr.vmem [resolvable:$true] %s15_s10 }
   0x4   :  { %p2853_p1 = scmp.lt.u32.totalorder %s2849_s13, %s3049_s0 }
   0x6   :  { %p2855_p2 = pnand %p2853_p1, %p2850_p0 }
   0x8   :  { %2858 = shalt.err (!%p2855_p2)
}
   0x9   :  { %s2859_s18 = scalar_lea.vmem %s16_s10, 32768  ;;  %p2864_p4 = scmp.lt.s32.totalorder %s16_s10, %s16_s10 }
   0xa   :  { %p2860_p3 = scmp.ne.s32.totalorder %s16_s10, %s2859_s18  ;;  %p2865_p5 = scmp.lt.s32.totalorder %s2859_s18, %s2859_s18 }
   0xc   :  { %p2866_p6 = por %p2865_p5, %p2864_p4 }
   0xe   :  { %p2867_p7 = pnand %p2866_p6, %p2860_p3 }
  0x10   :  { %2870 = shalt.err (!%p2867_p7)
}
  0x11   :  { %s2922_s19 = smov 256   ;;  %s2923_s20 = smov 16  }
  0x12   :  { %21 = dma.hbm_to_vmem [thread:$0]  %s3049_s0, 32768, %s16_s10, [#allocation3], %s2922_s19, %s2922_s19, %s2923_s20  }
  0x13   :  { %s2924_s23 = smov [#allocation5]   ;;  %s2871_s27 = scalar_lea.hbm %s3050_s1, 512 }
  0x14   :  { %s27_s24 = sshll.u32 %s2924_s23, 4  ;;  %p2872_p8 = scmp.ne.s32.totalorder %s3050_s1, %s2871_s27  ;;  %s28_s24 = int_to_ptr.vmem [resolvable:$true] %s27_s24 }
  0x15   :  { %p2875_p9 = scmp.lt.u32.totalorder %s2871_s27, %s3050_s1 }
  0x17   :  { %p2877_p10 = pnand %p2875_p9, %p2872_p8 }
  0x19   :  { %2880 = shalt.err (!%p2877_p10)
}
  0x1a   :  { %s2881_s4 = scalar_lea.vmem %s28_s24, 512  ;;  %p2886_p12 = scmp.lt.s32.totalorder %s28_s24, %s28_s24 }
  0x1b   :  { %p2882_p11 = scmp.ne.s32.totalorder %s28_s24, %s2881_s4  ;;  %p2887_p13 = scmp.lt.s32.totalorder %s2881_s4, %s2881_s4 }
  0x1d   :  { %p2888_p0 = por %p2887_p13, %p2886_p12 }
  0x1f   :  { %p2889_p1 = pnand %p2888_p0, %p2882_p11 }
  0x21   :  { %2892 = shalt.err (!%p2889_p1)
}
  0x22   :  { %33 = dma.hbm_to_vmem [thread:$0]  %s3050_s1, 512, %s28_s24, [#allocation6], %s2922_s19, %s2922_s19, %s2923_s20  }
  0x23   :  { %2915 = dma.done.wait [#allocation3], 32768  }
  0x24   :  { %2916 = vsyncadd [#allocation3], 4294934528 }
  0x25   :  { %2917 = dma.done.wait [#allocation6], 512  }
  0x26   :  { %2918 = vsyncadd [#allocation6], 4294966784  ;;  %v2449_v0 = vld [vmem:[#allocation2 + $0x4] ss:$16 sps:$4 sm:$0xff]   ;;  %v2451_v1 = vld [vmem:[#allocation2 + $0xc] ss:$16 sps:$4 sm:$0xff]   ;;  %v69_v38 = vlaneseq }
  0x27   :  { %1768 = vmatprep.subr.bf16.mxu0 %v2449_v0  ;;  %v2453_v2 = vld [vmem:[#allocation2] ss:$16 sps:$4 sm:$0xff]   ;;  %v2454_v3 = vld [vmem:[#allocation2 + $0x8] ss:$16 sps:$4 sm:$0xff]   ;;  %1932 = vmatprep.subr.bf16.mxu1 %v2451_v1  ;;  %v2455_v4 = vld [vmem:[#allocation2 + $0x24] ss:$16 sps:$4 sm:$0xff]  }
  0x28   :  { %1769 = vmatpush1.bf16.msra.mxu0 %v2453_v2  ;;  %1933 = vmatpush1.bf16.msra.mxu1 %v2454_v3  ;;  %v2457_v5 = vld [vmem:[#allocation2 + $0x2c] ss:$16 sps:$4 sm:$0xff]   ;;  %v2459_v6 = vld [vmem:[#allocation2 + $0x20] ss:$16 sps:$4 sm:$0xff]   ;;  %v2460_v7 = vld [vmem:[#allocation2 + $0x28] ss:$16 sps:$4 sm:$0xff]  }
  0x29   :  { %1770 = vmatprep.subr.bf16.mxu0 %v2455_v4  ;;  %1934 = vmatprep.subr.bf16.mxu1 %v2457_v5  ;;  %v2461_v8 = vld [vmem:[#allocation2 + $0x44] ss:$16 sps:$4 sm:$0xff]   ;;  %v2463_v9 = vld [vmem:[#allocation2 + $0x4c] ss:$16 sps:$4 sm:$0xff]   ;;  %v2465_v10 = vld [vmem:[#allocation2 + $0x40] ss:$16 sps:$4 sm:$0xff]  }
  0x2a   :  { %v2466_v11 = vld [vmem:[#allocation2 + $0x48] ss:$16 sps:$4 sm:$0xff]   ;;  %v2467_v12 = vld [vmem:[#allocation2 + $0x64] ss:$16 sps:$4 sm:$0xff]   ;;  %v2469_v13 = vld [vmem:[#allocation2 + $0x6c] ss:$16 sps:$4 sm:$0xff]  }
  0x2b   :  { %v2471_v14 = vld [vmem:[#allocation2 + $0x60] ss:$16 sps:$4 sm:$0xff]   ;;  %v2472_v15 = vld [vmem:[#allocation2 + $0x68] ss:$16 sps:$4 sm:$0xff]   ;;  %v2473_v16 = vld [vmem:[#allocation2 + $0x84] ss:$16 sps:$4 sm:$0xff]  }
  0x2c   :  { %1771 = vmatpush1.bf16.msra.mxu0 %v2459_v6  ;;  %1935 = vmatpush1.bf16.msra.mxu1 %v2460_v7  ;;  %v2475_v17 = vld [vmem:[#allocation2 + $0x8c] ss:$16 sps:$4 sm:$0xff]   ;;  %v2477_v18 = vld [vmem:[#allocation2 + $0x80] ss:$16 sps:$4 sm:$0xff]   ;;  %v2478_v19 = vld [vmem:[#allocation2 + $0x88] ss:$16 sps:$4 sm:$0xff]  }
  0x2d   :  { %1772 = vmatprep.subr.bf16.mxu0 %v2461_v8  ;;  %1936 = vmatprep.subr.bf16.mxu1 %v2463_v9  ;;  %v2479_v20 = vld [vmem:[#allocation2 + $0xa4] ss:$16 sps:$4 sm:$0xff]   ;;  %v2481_v21 = vld [vmem:[#allocation2 + $0xac] ss:$16 sps:$4 sm:$0xff]   ;;  %v2483_v22 = vld [vmem:[#allocation2 + $0xa0] ss:$16 sps:$4 sm:$0xff]  }
  0x2e   :  { %v2484_v23 = vld [vmem:[#allocation2 + $0xa8] ss:$16 sps:$4 sm:$0xff]   ;;  %v2485_v24 = vld [vmem:[#allocation2 + $0xc4] ss:$16 sps:$4 sm:$0xff]   ;;  %v2487_v25 = vld [vmem:[#allocation2 + $0xcc] ss:$16 sps:$4 sm:$0xff]  }
  0x2f   :  { %v2489_v26 = vld [vmem:[#allocation2 + $0xc0] ss:$16 sps:$4 sm:$0xff]   ;;  %v2490_v27 = vld [vmem:[#allocation2 + $0xc8] ss:$16 sps:$4 sm:$0xff]   ;;  %v2491_v28 = vld [vmem:[#allocation2 + $0xe4] ss:$16 sps:$4 sm:$0xff]  }
  0x30   :  { %1773 = vmatpush1.bf16.msra.mxu0 %v2465_v10  ;;  %1937 = vmatpush1.bf16.msra.mxu1 %v2466_v11  ;;  %v2493_v29 = vld [vmem:[#allocation2 + $0xec] ss:$16 sps:$4 sm:$0xff]   ;;  %v2495_v30 = vld [vmem:[#allocation2 + $0xe0] ss:$16 sps:$4 sm:$0xff]   ;;  %v2496_v31 = vld [vmem:[#allocation2 + $0xe8] ss:$16 sps:$4 sm:$0xff]  }
  0x31   :  { %1774 = vmatprep.subr.bf16.mxu0 %v2467_v12  ;;  %1938 = vmatprep.subr.bf16.mxu1 %v2469_v13  ;;  %v2497_v32 = vld [vmem:[#allocation2 + $0x104] ss:$16 sps:$4 sm:$0xff]   ;;  %v2499_v33 = vld [vmem:[#allocation2 + $0x10c] ss:$16 sps:$4 sm:$0xff]   ;;  %v2501_v34 = vld [vmem:[#allocation2 + $0x100] ss:$16 sps:$4 sm:$0xff]  }
  0x32   :  { %v2502_v35 = vld [vmem:[#allocation2 + $0x108] ss:$16 sps:$4 sm:$0xff]   ;;  %v2503_v36 = vld [vmem:[#allocation2 + $0x124] ss:$16 sps:$4 sm:$0xff]   ;;  %v2505_v37 = vld [vmem:[#allocation2 + $0x12c] ss:$16 sps:$4 sm:$0xff]  }
  0x33   :  { %v2507_v39 = vld [vmem:[#allocation2 + $0x120] ss:$16 sps:$4 sm:$0xff]   ;;  %v2508_v40 = vld [vmem:[#allocation2 + $0x128] ss:$16 sps:$4 sm:$0xff]   ;;  %v2509_v41 = vld [vmem:[#allocation2 + $0x144] ss:$16 sps:$4 sm:$0xff]  }
  0x34   :  { %1775 = vmatpush1.bf16.msra.mxu0 %v2471_v14  ;;  %1939 = vmatpush1.bf16.msra.mxu1 %v2472_v15  ;;  %v2511_v42 = vld [vmem:[#allocation2 + $0x14c] ss:$16 sps:$4 sm:$0xff]   ;;  %v2966_v43 = vshrl.u32 %v69_v38, 7  ;;  %v2513_v44 = vld [vmem:[#allocation2 + $0x140] ss:$16 sps:$4 sm:$0xff]   ;;  %vm184_vm0 = vcmask 1041409  }
  0x35   :  { %1776 = vmatprep.subr.bf16.mxu0 %v2473_v16  ;;  %1940 = vmatprep.subr.bf16.mxu1 %v2475_v17  ;;  %v2514_v45 = vld [vmem:[#allocation2 + $0x148] ss:$16 sps:$4 sm:$0xff]   ;;  %v2515_v46 = vld [vmem:[#allocation2 + $0x164] ss:$16 sps:$4 sm:$0xff]   ;;  %v2517_v47 = vld [vmem:[#allocation2 + $0x16c] ss:$16 sps:$4 sm:$0xff]  }
  0x36   :  { %v2519_v48 = vld [vmem:[#allocation2 + $0x160] ss:$16 sps:$4 sm:$0xff]   ;;  %v2520_v49 = vld [vmem:[#allocation2 + $0x168] ss:$16 sps:$4 sm:$0xff]   ;;  %v2969_v50 = vsub.s32 1, %v2966_v43  ;;  %v2972_v6 = vsub.s32 0, %v2966_v43 }
  0x37   :  { %v2521_v51 = vld [vmem:[#allocation2 + $0x184] ss:$16 sps:$4 sm:$0xff]   ;;  %v2523_v52 = vld [vmem:[#allocation2 + $0x18c] ss:$16 sps:$4 sm:$0xff]   ;;  %v2525_v1 = vld [vmem:[#allocation2 + $0x180] ss:$16 sps:$4 sm:$0xff]  }
  0x38   :  { %1777 = vmatpush1.bf16.msra.mxu0 %v2477_v18  ;;  %1941 = vmatpush1.bf16.msra.mxu1 %v2478_v19  ;;  %v40_v53 = vld [vmem:[#allocation5] ss:$4 sm:$0xf]  ;;  %v42_v54 = vld [vmem:[#allocation5 + $0x10] ss:$4 sm:$0xf] }
  0x39   :  { %1778 = vmatprep.subr.bf16.mxu0 %v2479_v20  ;;  %1942 = vmatprep.subr.bf16.mxu1 %v2481_v21  ;;  %v44_v55 = vld [vmem:[#allocation5 + $0x1] ss:$4 sm:$0xf]  ;;  %v46_v56 = vld [vmem:[#allocation5 + $0x11] ss:$4 sm:$0xf] }
  0x3a   :  { %v47_v57 = vadd.f32 %v44_v55, %v40_v53  ;;  %v48_v58 = vadd.f32 %v46_v56, %v42_v54  ;;  %v49_v59 = vmax.f32 %v40_v53, %v44_v55  ;;  %v52_v60 = vld [vmem:[#allocation5 + $0x2] ss:$4 sm:$0xf]  ;;  %v54_v61 = vld [vmem:[#allocation5 + $0x12] ss:$4 sm:$0xf]  ;;  %v50_v62 = vmax.f32 %v42_v54, %v46_v56 }
  0x3b   :  { %v60_v63 = vld [vmem:[#allocation5 + $0x3] ss:$4 sm:$0xf]  ;;  %v62_v0 = vld [vmem:[#allocation5 + $0x13] ss:$4 sm:$0xf] }
  0x3c   :  { %1779 = vmatpush1.bf16.msra.mxu0 %v2483_v22  ;;  %1943 = vmatpush1.bf16.msra.mxu1 %v2484_v23  ;;  %v2526_v2 = vld [vmem:[#allocation2 + $0x188] ss:$16 sps:$4 sm:$0xff]   ;;  %v55_v3 = vadd.f32 %v52_v60, %v47_v57  ;;  %v56_v4 = vadd.f32 %v54_v61, %v48_v58  ;;  %v57_v5 = vmax.f32 %v49_v59, %v52_v60  ;;  %v2527_v7 = vld [vmem:[#allocation2 + $0x1a4] ss:$16 sps:$4 sm:$0xff]   ;;  %v2975_v9 = vsub.s32 3, %v2966_v43  ;;  %s2926_s1 = smov [#allocation7]  }
  0x3d   :  { %1780 = vmatprep.subr.bf16.mxu0 %v2485_v24  ;;  %1944 = vmatprep.subr.bf16.mxu1 %v2487_v25  ;;  %v58_v8 = vmax.f32 %v50_v62, %v54_v61  ;;  %v2529_v10 = vld [vmem:[#allocation2 + $0x1ac] ss:$16 sps:$4 sm:$0xff]   ;;  %v2982_v15 = vsub.s32 2, %v2966_v43  ;;  %v2531_v16 = vld [vmem:[#allocation2 + $0x1a0] ss:$16 sps:$4 sm:$0xff]   ;;  %s2149_s6 = sshll.u32 %s2926_s1, 4  ;;  %s2150_s6 = int_to_ptr.vmem [resolvable:$true] %s2149_s6 }
  0x3e   :  { %v63_v11 = vadd.f32 %v60_v63, %v55_v3  ;;  %v64_v12 = vadd.f32 %v62_v0, %v56_v4  ;;  %v2977_v13 = vmax.f32 %v57_v5, %v60_v63  ;;  %v2532_v17 = vld [vmem:[#allocation2 + $0x1a8] ss:$16 sps:$4 sm:$0xff]   ;;  %v2533_v22 = vld [vmem:[#allocation2 + $0x1c4] ss:$16 sps:$4 sm:$0xff]   ;;  %v2543_v55 = vld [vmem:[#allocation2 + $0x1e0] ss:$16 sps:$4 sm:$0xff]   ;;  %p2898_p3 = scmp.lt.s32.totalorder %s2150_s6, %s2150_s6 }
  0x3f   :  { %v2979_v14 = vmax.f32 %v58_v8, %v62_v0  ;;  %v2544_v56 = vld [vmem:[#allocation2 + $0x1e8] ss:$16 sps:$4 sm:$0xff]   ;;  %v2547_v62 = vld [vmem:[#allocation2 + $0x204] ss:$16 sps:$4 sm:$0xff]   ;;  %s2893_s7 = scalar_lea.vmem %s2150_s6, 128 }
  0x40   :  { %1781 = vmatpush1.bf16.msra.mxu0 %v2489_v26  ;;  %1945 = vmatpush1.bf16.msra.mxu1 %v2490_v27  ;;  %v76_v18 = vrot.slane %v63_v11, %v2969_v50  ;;  %v92_v19 = vrot.slane %v64_v12, %v2969_v50  ;;  %v72_v20 = vrot.slane %v63_v11, %v2972_v6  ;;  %v2535_v26 = vld [vmem:[#allocation2 + $0x1cc] ss:$16 sps:$4 sm:$0xff]   ;;  %v2548_v8 = vld [vmem:[#allocation2 + $0x208] ss:$16 sps:$4 sm:$0xff]   ;;  %p2894_p2 = scmp.ne.s32.totalorder %s2150_s6, %s2893_s7  ;;  %p2899_p4 = scmp.lt.s32.totalorder %s2893_s7, %s2893_s7 }
  0x41   :  { %1782 = vmatprep.subr.bf16.mxu0 %v2491_v28  ;;  %1946 = vmatprep.subr.bf16.mxu1 %v2493_v29  ;;  %v88_v21 = vrot.slane %v64_v12, %v2972_v6  ;;  %v84_v23 = vrot.slane %v63_v11, %v2975_v9  ;;  %v100_v24 = vrot.slane %v64_v12, %v2975_v9 }
  0x42   :  { %v80_v25 = vrot.slane %v63_v11, %v2982_v15  ;;  %v110_v27 = vpack.c.bf16 %v76_v18, %v76_v18  ;;  %v114_v28 = vpack.c.bf16 %v92_v19, %v92_v19  ;;  %v109_v29 = vpack.c.bf16 %v72_v20, %v72_v20  ;;  %v2556_v19 = vld [vmem:[#allocation2 + $0x22c] ss:$16 sps:$4 sm:$0xff]   ;;  %p2900_p5 = por %p2899_p4, %p2898_p3 }
  0x43   :  { %v126_v54 = vrot.slane %v2977_v13, %v2969_v50  ;;  %v122_v60 = vrot.slane %v2977_v13, %v2972_v6 }
  0x44   :  { %1783 = vmatpush1.bf16.msra.mxu0 %v2495_v30  ;;  %1947 = vmatpush1.bf16.msra.mxu1 %v2496_v31  ;;  %v113_v30 = vpack.c.bf16 %v88_v21, %v88_v21  ;;  %v112_v31 = vpack.c.bf16 %v84_v23, %v84_v23  ;;  %v111_v38 = vpack.c.bf16 %v80_v25, %v80_v25  ;;  %v2551_v23 = vld [vmem:[#allocation2 + $0x220] ss:$16 sps:$4 sm:$0xff]   ;;  %v2559_v25 = vld [vmem:[#allocation2 + $0x244] ss:$16 sps:$4 sm:$0xff]   ;;  %p2901_p6 = pnand %p2900_p5, %p2894_p2 }
  0x45   :  { %1784 = vmatprep.subr.bf16.mxu0 %v2497_v32  ;;  %1948 = vmatprep.subr.bf16.mxu1 %v2499_v33  ;;  %v116_v32 = vpack.c.bf16 %v100_v24, %v100_v24  ;;  %v96_v33 = vrot.slane %v64_v12, %v2982_v15  ;;  %v159_v3 = vpack.c.bf16 %v122_v60, %v122_v60  ;;  %v2554_v24 = vld [vmem:[#allocation2 + $0x228] ss:$16 sps:$4 sm:$0xff]   ;;  %v2607_v60 = vld [vmem:[#allocation2 + $0x344] ss:$16 sps:$4 sm:$0xff]  }
  0x48   :  { %1785 = vmatpush1.bf16.msra.mxu0 %v2501_v34  ;;  %1949 = vmatpush1.bf16.msra.mxu1 %v2502_v35  ;;  %v2537_v34 = vld [vmem:[#allocation2 + $0x1c0] ss:$16 sps:$4 sm:$0xff]   ;;  %v2538_v35 = vld [vmem:[#allocation2 + $0x1c8] ss:$16 sps:$4 sm:$0xff]  }
  0x49   :  { %1786 = vmatprep.subr.bf16.mxu0 %v2503_v36  ;;  %1950 = vmatprep.subr.bf16.mxu1 %v2505_v37  ;;  %v176_v36 = vunpack.c.l.b16 %v110_v27  ;;  %v180_v37 = vunpack.c.l.b16 %v114_v28  ;;  %v2562_v27 = vld [vmem:[#allocation2 + $0x24c] ss:$16 sps:$4 sm:$0xff]   ;;  %v2557_v28 = vld [vmem:[#allocation2 + $0x240] ss:$16 sps:$4 sm:$0xff]  }
  0x4c   :  { %1787 = vmatpush1.bf16.msra.mxu0 %v2507_v39  ;;  %1951 = vmatpush1.bf16.msra.mxu1 %v2508_v40  ;;  %v2539_v39 = vld [vmem:[#allocation2 + $0x1e4] ss:$16 sps:$4 sm:$0xff]   ;;  %v175_v40 = vunpack.c.l.b16 %v109_v29  ;;  %v2560_v29 = vld [vmem:[#allocation2 + $0x248] ss:$16 sps:$4 sm:$0xff]  }
  0x4d   :  { %1788 = vmatprep.subr.bf16.mxu0 %v2509_v41  ;;  %1952 = vmatprep.subr.bf16.mxu1 %v2511_v42  ;;  %v179_v41 = vunpack.c.l.b16 %v113_v30  ;;  %v182_v42 = vunpack.c.l.b16 %v116_v32  ;;  %v2565_v30 = vld [vmem:[#allocation2 + $0x264] ss:$16 sps:$4 sm:$0xff]   ;;  %v2563_v32 = vld [vmem:[#allocation2 + $0x260] ss:$16 sps:$4 sm:$0xff]  }
  0x4f   :  { %v190_v58 = vrot.slane %v182_v42, 7  ;;  %v2583_v42 = vld [vmem:[#allocation2 + $0x2c4] ss:$16 sps:$4 sm:$0xff]  }
  0x50   :  { %1789 = vmatpush1.bf16.msra.mxu0 %v2513_v44  ;;  %1953 = vmatpush1.bf16.msra.mxu1 %v2514_v45  ;;  %v115_v44 = vpack.c.bf16 %v96_v33, %v96_v33  ;;  %v2541_v45 = vld [vmem:[#allocation2 + $0x1ec] ss:$16 sps:$4 sm:$0xff]   ;;  %v2566_v33 = vld [vmem:[#allocation2 + $0x268] ss:$16 sps:$4 sm:$0xff]  }
  0x51   :  { %1790 = vmatprep.subr.bf16.mxu0 %v2515_v46  ;;  %1954 = vmatprep.subr.bf16.mxu1 %v2517_v47  ;;  %v186_v46 = vrot.slane %v180_v37, 7  ;;  %v178_v47 = vunpack.c.l.b16 %v112_v31  ;;  %v2568_v31 = vld [vmem:[#allocation2 + $0x26c] ss:$16 sps:$4 sm:$0xff]   ;;  %v2572_v37 = vld [vmem:[#allocation2 + $0x288] ss:$16 sps:$4 sm:$0xff]  }
  0x52   :  { %v181_v53 = vunpack.c.l.b16 %v115_v44  ;;  %v2586_v44 = vld [vmem:[#allocation2 + $0x2cc] ss:$16 sps:$4 sm:$0xff]  }
  0x53   :  { %v187_v57 = vsel %vm184_vm0, %v186_v46, %v176_v36  ;;  %v191_v11 = vsel %vm184_vm0, %v190_v58, %v178_v47  ;;  %v2569_v36 = vld [vmem:[#allocation2 + $0x280] ss:$16 sps:$4 sm:$0xff]   ;;  %v2584_v46 = vld [vmem:[#allocation2 + $0x2c8] ss:$16 sps:$4 sm:$0xff]   ;;  %v2589_v47 = vld [vmem:[#allocation2 + $0x2e4] ss:$16 sps:$4 sm:$0xff]  }
  0x54   :  { %1791 = vmatpush1.bf16.msra.mxu0 %v2519_v48  ;;  %1955 = vmatpush1.bf16.msra.mxu1 %v2520_v49  ;;  %v142_v48 = vrot.slane %v2979_v14, %v2969_v50  ;;  %v138_v49 = vrot.slane %v2979_v14, %v2972_v6  ;;  %v193_v61 = vpack.c.b16 %v187_v57, %v187_v57  ;;  %v188_v0 = vrot.slane %v181_v53, 7  ;;  %v2550_v50 = vld [vmem:[#allocation2 + $0x20c] ss:$16 sps:$4 sm:$0xff]   ;;  %v2599_v58 = vld [vmem:[#allocation2 + $0x320] ss:$16 sps:$4 sm:$0xff]  }
  0x55   :  { %1792 = vmatprep.subr.bf16.mxu0 %v2521_v51  ;;  %1956 = vmatprep.subr.bf16.mxu1 %v2523_v52  ;;  %v183_v51 = vrot.slane %v179_v41, 7  ;;  %v177_v52 = vunpack.c.l.b16 %v111_v38  ;;  %v195_v21 = vpack.c.b16 %v191_v11, %v191_v11  ;;  %v2577_v38 = vld [vmem:[#allocation2 + $0x2a4] ss:$16 sps:$4 sm:$0xff]   ;;  %v2578_v41 = vld [vmem:[#allocation2 + $0x2a8] ss:$16 sps:$4 sm:$0xff]  }
  0x56   :  { %v164_v59 = vpack.c.bf16 %v142_v48, %v142_v48  ;;  %1800 = vmatprep.mubr.bf16.mxu0 %v193_v61  ;;  %1964 = vmatprep.mubr.bf16.mxu1 %v193_v61  ;;  %v163_v6 = vpack.c.bf16 %v138_v49, %v138_v49  ;;  %v2592_v48 = vld [vmem:[#allocation2 + $0x2ec] ss:$16 sps:$4 sm:$0xff]   ;;  %v2587_v49 = vld [vmem:[#allocation2 + $0x2e0] ss:$16 sps:$4 sm:$0xff]  }
  0x57   :  { %v185_v63 = vsel %vm184_vm0, %v183_v51, %v175_v40  ;;  %v3003_v4 = vsel %vm184_vm0, %v188_v0, %v177_v52  ;;  %v2575_v40 = vld [vmem:[#allocation2 + $0x2a0] ss:$16 sps:$4 sm:$0xff]   ;;  %v2590_v51 = vld [vmem:[#allocation2 + $0x2e8] ss:$16 sps:$4 sm:$0xff]   ;;  %v2595_v52 = vld [vmem:[#allocation2 + $0x304] ss:$16 sps:$4 sm:$0xff]  }
  0x58   :  { %1793 = vmatpush1.bf16.msra.mxu0 %v2525_v1  ;;  %1957 = vmatpush1.bf16.msra.mxu1 %v2526_v2  ;;  %v160_v1 = vpack.c.bf16 %v126_v54, %v126_v54  ;;  %v213_v2 = vunpack.c.l.b16 %v164_v59  ;;  %v212_v18 = vunpack.c.l.b16 %v163_v6  ;;  %v2598_v53 = vld [vmem:[#allocation2 + $0x30c] ss:$16 sps:$4 sm:$0xff]   ;;  %v2593_v54 = vld [vmem:[#allocation2 + $0x300] ss:$16 sps:$4 sm:$0xff]   ;;  %v2602_v59 = vld [vmem:[#allocation2 + $0x328] ss:$16 sps:$4 sm:$0xff]  }
  0x59   :  { %1794 = vmatprep.subr.bf16.mxu0 %v2527_v7  ;;  %1958 = vmatprep.subr.bf16.mxu1 %v2529_v10  ;;  %v2545_v7 = vld [vmem:[#allocation2 + $0x200] ss:$16 sps:$4 sm:$0xff]   ;;  %v192_v10 = vpack.c.b16 %v185_v63, %v185_v63  ;;  %v2604_v57 = vld [vmem:[#allocation2 + $0x32c] ss:$16 sps:$4 sm:$0xff]   ;;  %v2608_v63 = vld [vmem:[#allocation2 + $0x348] ss:$16 sps:$4 sm:$0xff]  }
  0x5a   :  { %v209_v5 = vunpack.c.l.b16 %v160_v1  ;;  %v218_v12 = vrot.slane %v213_v2, 7  ;;  %v2610_v61 = vld [vmem:[#allocation2 + $0x34c] ss:$16 sps:$4 sm:$0xff]   ;;  %v2613_v0 = vld [vmem:[#allocation2 + $0x364] ss:$16 sps:$4 sm:$0xff]  }
  0x5b   :  { %v2616_v1 = vld [vmem:[#allocation2 + $0x36c] ss:$16 sps:$4 sm:$0xff]   ;;  %v2614_v2 = vld [vmem:[#allocation2 + $0x368] ss:$16 sps:$4 sm:$0xff]   ;;  %v2617_v6 = vld [vmem:[#allocation2 + $0x380] ss:$16 sps:$4 sm:$0xff]  }
  0x5c   :  { %1795 = vmatpush1.bf16.msra.mxu0 %v2531_v16  ;;  %1959 = vmatpush1.bf16.msra.mxu1 %v2532_v17  ;;  %v2553_v16 = vld [vmem:[#allocation2 + $0x224] ss:$16 sps:$4 sm:$0xff]   ;;  %v208_v17 = vunpack.c.l.b16 %v159_v3  ;;  %v3007_v20 = vsel %vm184_vm0, %v218_v12, %v209_v5  ;;  %v2622_v5 = vld [vmem:[#allocation2 + $0x38c] ss:$16 sps:$4 sm:$0xff]   ;;  %v2623_v11 = vld [vmem:[#allocation2 + $0x3a0] ss:$16 sps:$4 sm:$0xff]  }
  0x5d   :  { %1796 = vmatprep.subr.bf16.mxu0 %v2533_v22  ;;  %1960 = vmatprep.subr.bf16.mxu1 %v2535_v26  ;;  %v216_v22 = vrot.slane %v212_v18, 7  ;;  %v2619_v3 = vld [vmem:[#allocation2 + $0x384] ss:$16 sps:$4 sm:$0xff]   ;;  %v2626_v12 = vld [vmem:[#allocation2 + $0x3a8] ss:$16 sps:$4 sm:$0xff]  }
  0x5e   :  { %v2629_v18 = vld [vmem:[#allocation2 + $0x3c0] ss:$16 sps:$4 sm:$0xff]  }
  0x5f   :  { %v3010_v26 = vsel %vm184_vm0, %v216_v22, %v208_v17  ;;  %v2634_v17 = vld [vmem:[#allocation2 + $0x3cc] ss:$16 sps:$4 sm:$0xff]   ;;  %v2637_v22 = vld [vmem:[#allocation2 + $0x3e4] ss:$16 sps:$4 sm:$0xff]  }
  0x60   :  { %1797 = vmatpush1.bf16.msra.mxu0 %v2537_v34  ;;  %1961 = vmatpush1.bf16.msra.mxu1 %v2538_v35  ;;  %v2571_v34 = vld [vmem:[#allocation2 + $0x284] ss:$16 sps:$4 sm:$0xff]   ;;  %v2574_v35 = vld [vmem:[#allocation2 + $0x28c] ss:$16 sps:$4 sm:$0xff]  }
  0x61   :  { %1798 = vmatprep.subr.bf16.mxu0 %v2539_v39  ;;  %1962 = vmatprep.subr.bf16.mxu1 %v2541_v45  ;;  %v2580_v39 = vld [vmem:[#allocation2 + $0x2ac] ss:$16 sps:$4 sm:$0xff]   ;;  %v2581_v45 = vld [vmem:[#allocation2 + $0x2c0] ss:$16 sps:$4 sm:$0xff]  }
  0x64   :  { %1799 = vmatpush1.bf16.msra.mxu0 %v2543_v55  ;;  %1963 = vmatpush1.bf16.msra.mxu1 %v2544_v56  ;;  %v2596_v55 = vld [vmem:[#allocation2 + $0x308] ss:$16 sps:$4 sm:$0xff]   ;;  %v2601_v56 = vld [vmem:[#allocation2 + $0x324] ss:$16 sps:$4 sm:$0xff]  }
  0x65   :  { %1809 = vmatprep.subr.bf16.mxu0 %v2547_v62  ;;  %1973 = vmatprep.subr.bf16.mxu1 %v2550_v50  ;;  %v2605_v62 = vld [vmem:[#allocation2 + $0x340] ss:$16 sps:$4 sm:$0xff]  }
  0x66   :  { %v2611_v50 = vld [vmem:[#allocation2 + $0x360] ss:$16 sps:$4 sm:$0xff]  }
  0x67   :  { %1801 = vmatmul.mubr.bf16.vlgmr.msra.gmra.mrb[0].mxu0 %v192_v10  ;;  %1965 = vmatmul.mubr.bf16.vlgmr.msra.gmra.mrb[0].mxu1 %v192_v10  ;;  %v2628_v10 = vld [vmem:[#allocation2 + $0x3ac] ss:$16 sps:$4 sm:$0xff]  }
  0x68   :  { %1810 = vmatpush1.bf16.msra.mxu0 %v2545_v7  ;;  %1974 = vmatpush1.bf16.msra.mxu1 %v2548_v8  ;;  %v2620_v7 = vld [vmem:[#allocation2 + $0x388] ss:$16 sps:$4 sm:$0xff]   ;;  %v2625_v8 = vld [vmem:[#allocation2 + $0x3a4] ss:$16 sps:$4 sm:$0xff]  }
  0x69   :  { %1811 = vmatprep.subr.bf16.mxu0 %v2553_v16  ;;  %1975 = vmatprep.subr.bf16.mxu1 %v2556_v19  ;;  %v2631_v16 = vld [vmem:[#allocation2 + $0x3c4] ss:$16 sps:$4 sm:$0xff]   ;;  %v2632_v19 = vld [vmem:[#allocation2 + $0x3c8] ss:$16 sps:$4 sm:$0xff]  }
  0x6a   :  { %1841 = vmatprep.mubr.bf16.mxu0 %v195_v21  ;;  %2005 = vmatprep.mubr.bf16.mxu1 %v195_v21  ;;  %v150_v21 = vrot.slane %v2979_v14, %v2975_v9 }
  0x6c   :  { %1812 = vmatpush1.bf16.msra.mxu0 %v2551_v23  ;;  %1976 = vmatpush1.bf16.msra.mxu1 %v2554_v24  ;;  %v146_v23 = vrot.slane %v2979_v14, %v2982_v15  ;;  %v2640_v24 = vld [vmem:[#allocation2 + $0x3ec] ss:$16 sps:$4 sm:$0xff]  }
  0x6d   :  { %1813 = vmatprep.subr.bf16.mxu0 %v2559_v25  ;;  %1977 = vmatprep.subr.bf16.mxu1 %v2562_v27  ;;  %v134_v25 = vrot.slane %v2977_v13, %v2975_v9  ;;  %v166_v27 = vpack.c.bf16 %v150_v21, %v150_v21  ;;  %v2703_v21 = vld [vmem:[#allocation2 + $0x544] ss:$16 sps:$4 sm:$0xff]  }
  0x70   :  { %1814 = vmatpush1.bf16.msra.mxu0 %v2557_v28  ;;  %1978 = vmatpush1.bf16.msra.mxu1 %v2560_v29  ;;  %v130_v28 = vrot.slane %v2977_v13, %v2982_v15  ;;  %v165_v29 = vpack.c.bf16 %v146_v23, %v146_v23  ;;  %v194_v13 = vpack.c.b16 %v3003_v4, %v3003_v4  ;;  %v2655_v4 = vld [vmem:[#allocation2 + $0x444] ss:$16 sps:$4 sm:$0xff]   ;;  %v2701_v23 = vld [vmem:[#allocation2 + $0x540] ss:$16 sps:$4 sm:$0xff]  }
  0x71   :  { %1815 = vmatprep.subr.bf16.mxu0 %v2565_v30  ;;  %1979 = vmatprep.subr.bf16.mxu1 %v2568_v31  ;;  %v2635_v30 = vld [vmem:[#allocation2 + $0x3e0] ss:$16 sps:$4 sm:$0xff]   ;;  %v2638_v31 = vld [vmem:[#allocation2 + $0x3e8] ss:$16 sps:$4 sm:$0xff]  }
  0x72   :  { %v214_v14 = vunpack.c.l.b16 %v165_v29  ;;  %v2710_v29 = vld [vmem:[#allocation2 + $0x568] ss:$16 sps:$4 sm:$0xff]  }
  0x74   :  { %1816 = vmatpush1.bf16.msra.mxu0 %v2563_v32  ;;  %1980 = vmatpush1.bf16.msra.mxu1 %v2566_v33  ;;  %v162_v32 = vpack.c.bf16 %v134_v25, %v134_v25  ;;  %v215_v33 = vunpack.c.l.b16 %v166_v27  ;;  %v2709_v25 = vld [vmem:[#allocation2 + $0x564] ss:$16 sps:$4 sm:$0xff]   ;;  %v2712_v27 = vld [vmem:[#allocation2 + $0x56c] ss:$16 sps:$4 sm:$0xff]  }
  0x75   :  { %1817 = vmatprep.subr.bf16.mxu0 %v2571_v34  ;;  %1981 = vmatprep.subr.bf16.mxu1 %v2574_v35  ;;  %v2643_v34 = vld [vmem:[#allocation2 + $0x404] ss:$16 sps:$4 sm:$0xff]   ;;  %v161_v35 = vpack.c.bf16 %v130_v28, %v130_v28  ;;  %v2707_v28 = vld [vmem:[#allocation2 + $0x560] ss:$16 sps:$4 sm:$0xff]  }
  0x77   :  { %v210_v9 = vunpack.c.l.b16 %v161_v35  ;;  %v2724_v35 = vld [vmem:[#allocation2 + $0x5ac] ss:$16 sps:$4 sm:$0xff]  }
  0x78   :  { %1818 = vmatpush1.bf16.msra.mxu0 %v2569_v36  ;;  %1982 = vmatpush1.bf16.msra.mxu1 %v2572_v37  ;;  %v2646_v36 = vld [vmem:[#allocation2 + $0x40c] ss:$16 sps:$4 sm:$0xff]   ;;  %v211_v37 = vunpack.c.l.b16 %v162_v32  ;;  %v2713_v32 = vld [vmem:[#allocation2 + $0x580] ss:$16 sps:$4 sm:$0xff]  }
  0x79   :  { %1819 = vmatprep.subr.bf16.mxu0 %v2577_v38  ;;  %1983 = vmatprep.subr.bf16.mxu1 %v2580_v39  ;;  %v222_v38 = vrot.slane %v215_v33, 7  ;;  %v220_v39 = vrot.slane %v214_v14, 7  ;;  %v2716_v33 = vld [vmem:[#allocation2 + $0x588] ss:$16 sps:$4 sm:$0xff]   ;;  %v2719_v14 = vld [vmem:[#allocation2 + $0x5a0] ss:$16 sps:$4 sm:$0xff]  }
  0x7b   :  { %v3023_v15 = vsel %vm184_vm0, %v222_v38, %v211_v37  ;;  %v2727_v37 = vld [vmem:[#allocation2 + $0x5c4] ss:$16 sps:$4 sm:$0xff]   ;;  %v2730_v38 = vld [vmem:[#allocation2 + $0x5cc] ss:$16 sps:$4 sm:$0xff]  }
  0x7c   :  { %1820 = vmatpush1.bf16.msra.mxu0 %v2575_v40  ;;  %1984 = vmatpush1.bf16.msra.mxu1 %v2578_v41  ;;  %v2641_v40 = vld [vmem:[#allocation2 + $0x400] ss:$16 sps:$4 sm:$0xff]   ;;  %v2644_v41 = vld [vmem:[#allocation2 + $0x408] ss:$16 sps:$4 sm:$0xff]  }
  0x7d   :  { %1821 = vmatprep.subr.bf16.mxu0 %v2583_v42  ;;  %1985 = vmatprep.subr.bf16.mxu1 %v2586_v44  ;;  %v2649_v42 = vld [vmem:[#allocation2 + $0x424] ss:$16 sps:$4 sm:$0xff]   ;;  %v3026_v44 = vsel %vm184_vm0, %v220_v39, %v210_v9  ;;  %v2725_v9 = vld [vmem:[#allocation2 + $0x5c0] ss:$16 sps:$4 sm:$0xff]   ;;  %v2728_v39 = vld [vmem:[#allocation2 + $0x5c8] ss:$16 sps:$4 sm:$0xff]  }
  0x80   :  { %1822 = vmatpush1.bf16.msra.mxu0 %v2581_v45  ;;  %1986 = vmatpush1.bf16.msra.mxu1 %v2584_v46  ;;  %v2652_v45 = vld [vmem:[#allocation2 + $0x42c] ss:$16 sps:$4 sm:$0xff]   ;;  %v225_v46 = vpack.c.b16 %v3007_v20, %v3007_v20 }
  0x81   :  { %1823 = vmatprep.subr.bf16.mxu0 %v2589_v47  ;;  %1987 = vmatprep.subr.bf16.mxu1 %v2592_v48  ;;  %v2647_v47 = vld [vmem:[#allocation2 + $0x420] ss:$16 sps:$4 sm:$0xff]   ;;  %v2650_v48 = vld [vmem:[#allocation2 + $0x428] ss:$16 sps:$4 sm:$0xff]   ;;  %v2664_v20 = vld [vmem:[#allocation2 + $0x46c] ss:$16 sps:$4 sm:$0xff]  }
  0x84   :  { %1824 = vmatpush1.bf16.msra.mxu0 %v2587_v49  ;;  %1988 = vmatpush1.bf16.msra.mxu1 %v2590_v51  ;;  %v2658_v49 = vld [vmem:[#allocation2 + $0x44c] ss:$16 sps:$4 sm:$0xff]   ;;  %v2653_v51 = vld [vmem:[#allocation2 + $0x440] ss:$16 sps:$4 sm:$0xff]  }
  0x85   :  { %1825 = vmatprep.subr.bf16.mxu0 %v2595_v52  ;;  %1989 = vmatprep.subr.bf16.mxu1 %v2598_v53  ;;  %v2656_v52 = vld [vmem:[#allocation2 + $0x448] ss:$16 sps:$4 sm:$0xff]   ;;  %v2661_v53 = vld [vmem:[#allocation2 + $0x464] ss:$16 sps:$4 sm:$0xff]  }
  0x88   :  { %1826 = vmatpush1.bf16.msra.mxu0 %v2593_v54  ;;  %1990 = vmatpush1.bf16.msra.mxu1 %v2596_v55  ;;  %v2659_v54 = vld [vmem:[#allocation2 + $0x460] ss:$16 sps:$4 sm:$0xff]   ;;  %v2662_v55 = vld [vmem:[#allocation2 + $0x468] ss:$16 sps:$4 sm:$0xff]  }
  0x89   :  { %1827 = vmatprep.subr.bf16.mxu0 %v2601_v56  ;;  %1991 = vmatprep.subr.bf16.mxu1 %v2604_v57  ;;  %v2667_v56 = vld [vmem:[#allocation2 + $0x484] ss:$16 sps:$4 sm:$0xff]   ;;  %v2670_v57 = vld [vmem:[#allocation2 + $0x48c] ss:$16 sps:$4 sm:$0xff]  }
  0x8c   :  { %1828 = vmatpush1.bf16.msra.mxu0 %v2599_v58  ;;  %1992 = vmatpush1.bf16.msra.mxu1 %v2602_v59  ;;  %v2665_v58 = vld [vmem:[#allocation2 + $0x480] ss:$16 sps:$4 sm:$0xff]   ;;  %v2668_v59 = vld [vmem:[#allocation2 + $0x488] ss:$16 sps:$4 sm:$0xff]  }
  0x8d   :  { %1829 = vmatprep.subr.bf16.mxu0 %v2607_v60  ;;  %1993 = vmatprep.subr.bf16.mxu1 %v2610_v61  ;;  %v2673_v60 = vld [vmem:[#allocation2 + $0x4a4] ss:$16 sps:$4 sm:$0xff]   ;;  %v2676_v61 = vld [vmem:[#allocation2 + $0x4ac] ss:$16 sps:$4 sm:$0xff]  }
  0x90   :  { %1830 = vmatpush1.bf16.msra.mxu0 %v2605_v62  ;;  %1994 = vmatpush1.bf16.msra.mxu1 %v2608_v63  ;;  %v2671_v62 = vld [vmem:[#allocation2 + $0x4a0] ss:$16 sps:$4 sm:$0xff]   ;;  %v2674_v63 = vld [vmem:[#allocation2 + $0x4a8] ss:$16 sps:$4 sm:$0xff]  }
  0x91   :  { %1831 = vmatprep.subr.bf16.mxu0 %v2613_v0  ;;  %1995 = vmatprep.subr.bf16.mxu1 %v2616_v1  ;;  %v2679_v0 = vld [vmem:[#allocation2 + $0x4c4] ss:$16 sps:$4 sm:$0xff]   ;;  %v2682_v1 = vld [vmem:[#allocation2 + $0x4cc] ss:$16 sps:$4 sm:$0xff]  }
  0x94   :  { %1832 = vmatpush1.bf16.msra.mxu0 %v2611_v50  ;;  %1996 = vmatpush1.bf16.msra.mxu1 %v2614_v2  ;;  %v2677_v50 = vld [vmem:[#allocation2 + $0x4c0] ss:$16 sps:$4 sm:$0xff]   ;;  %v2680_v2 = vld [vmem:[#allocation2 + $0x4c8] ss:$16 sps:$4 sm:$0xff]  }
  0x95   :  { %1833 = vmatprep.subr.bf16.mxu0 %v2619_v3  ;;  %1997 = vmatprep.subr.bf16.mxu1 %v2622_v5  ;;  %v2685_v3 = vld [vmem:[#allocation2 + $0x4e4] ss:$16 sps:$4 sm:$0xff]   ;;  %v2688_v5 = vld [vmem:[#allocation2 + $0x4ec] ss:$16 sps:$4 sm:$0xff]  }
  0x98   :  { %1834 = vmatpush1.bf16.msra.mxu0 %v2617_v6  ;;  %1998 = vmatpush1.bf16.msra.mxu1 %v2620_v7  ;;  %v2683_v6 = vld [vmem:[#allocation2 + $0x4e0] ss:$16 sps:$4 sm:$0xff]   ;;  %v2686_v7 = vld [vmem:[#allocation2 + $0x4e8] ss:$16 sps:$4 sm:$0xff]  }
  0x99   :  { %1835 = vmatprep.subr.bf16.mxu0 %v2625_v8  ;;  %1999 = vmatprep.subr.bf16.mxu1 %v2628_v10  ;;  %v2691_v8 = vld [vmem:[#allocation2 + $0x504] ss:$16 sps:$4 sm:$0xff]   ;;  %v2694_v10 = vld [vmem:[#allocation2 + $0x50c] ss:$16 sps:$4 sm:$0xff]  }
  0x9c   :  { %1836 = vmatpush1.bf16.msra.mxu0 %v2623_v11  ;;  %2000 = vmatpush1.bf16.msra.mxu1 %v2626_v12  ;;  %v2689_v11 = vld [vmem:[#allocation2 + $0x500] ss:$16 sps:$4 sm:$0xff]   ;;  %v2692_v12 = vld [vmem:[#allocation2 + $0x508] ss:$16 sps:$4 sm:$0xff]  }
  0x9d   :  { %1837 = vmatprep.subr.bf16.mxu0 %v2631_v16  ;;  %2001 = vmatprep.subr.bf16.mxu1 %v2634_v17  ;;  %v2697_v16 = vld [vmem:[#allocation2 + $0x524] ss:$16 sps:$4 sm:$0xff]   ;;  %v2700_v17 = vld [vmem:[#allocation2 + $0x52c] ss:$16 sps:$4 sm:$0xff]  }
  0xa0   :  { %1838 = vmatpush1.bf16.msra.mxu0 %v2629_v18  ;;  %2002 = vmatpush1.bf16.msra.mxu1 %v2632_v19  ;;  %v2695_v18 = vld [vmem:[#allocation2 + $0x520] ss:$16 sps:$4 sm:$0xff]   ;;  %v2698_v19 = vld [vmem:[#allocation2 + $0x528] ss:$16 sps:$4 sm:$0xff]  }
  0xa1   :  { %1839 = vmatprep.subr.bf16.mxu0 %v2637_v22  ;;  %2003 = vmatprep.subr.bf16.mxu1 %v2640_v24  ;;  %v2706_v22 = vld [vmem:[#allocation2 + $0x54c] ss:$16 sps:$4 sm:$0xff]   ;;  %v2704_v24 = vld [vmem:[#allocation2 + $0x548] ss:$16 sps:$4 sm:$0xff]  }
  0xa4   :  { %1840 = vmatpush1.bf16.msra.mxu0 %v2635_v30  ;;  %2004 = vmatpush1.bf16.msra.mxu1 %v2638_v31  ;;  %v2715_v30 = vld [vmem:[#allocation2 + $0x584] ss:$16 sps:$4 sm:$0xff]   ;;  %v2718_v31 = vld [vmem:[#allocation2 + $0x58c] ss:$16 sps:$4 sm:$0xff]  }
  0xa5   :  { %1850 = vmatprep.subr.bf16.mxu0 %v2643_v34  ;;  %2014 = vmatprep.subr.bf16.mxu1 %v2646_v36  ;;  %v2721_v34 = vld [vmem:[#allocation2 + $0x5a4] ss:$16 sps:$4 sm:$0xff]   ;;  %v2722_v36 = vld [vmem:[#allocation2 + $0x5a8] ss:$16 sps:$4 sm:$0xff]  }
  0xa7   :  { %1842 = vmatmul.mubr.bf16.vlgmr.msra.gmra.mrb[0].mxu0 %v194_v13  ;;  %2006 = vmatmul.mubr.bf16.vlgmr.msra.gmra.mrb[0].mxu1 %v194_v13  ;;  %v2731_v13 = vld [vmem:[#allocation2 + $0x5e0] ss:$16 sps:$4 sm:$0xff]  }
  0xa8   :  { %1851 = vmatpush1.bf16.msra.mxu0 %v2641_v40  ;;  %2015 = vmatpush1.bf16.msra.mxu1 %v2644_v41  ;;  %v2733_v40 = vld [vmem:[#allocation2 + $0x5e4] ss:$16 sps:$4 sm:$0xff]   ;;  %v2736_v41 = vld [vmem:[#allocation2 + $0x5ec] ss:$16 sps:$4 sm:$0xff]  }
  0xa9   :  { %1852 = vmatprep.subr.bf16.mxu0 %v2649_v42  ;;  %2016 = vmatprep.subr.bf16.mxu1 %v2652_v45  ;;  %v2734_v42 = vld [vmem:[#allocation2 + $0x5e8] ss:$16 sps:$4 sm:$0xff]   ;;  %v2739_v45 = vld [vmem:[#allocation2 + $0x604] ss:$16 sps:$4 sm:$0xff]  }
  0xaa   :  { %1882 = vmatprep.mubr.bf16.mxu0 %v225_v46  ;;  %2046 = vmatprep.mubr.bf16.mxu1 %v225_v46  ;;  %v2742_v46 = vld [vmem:[#allocation2 + $0x60c] ss:$16 sps:$4 sm:$0xff]  }
  0xac   :  { %1853 = vmatpush1.bf16.msra.mxu0 %v2647_v47  ;;  %2017 = vmatpush1.bf16.msra.mxu1 %v2650_v48  ;;  %v224_v47 = vpack.c.b16 %v3010_v26, %v3010_v26  ;;  %v2737_v48 = vld [vmem:[#allocation2 + $0x600] ss:$16 sps:$4 sm:$0xff]   ;;  %v2751_v26 = vld [vmem:[#allocation2 + $0x644] ss:$16 sps:$4 sm:$0xff]  }
  0xad   :  { %1854 = vmatprep.subr.bf16.mxu0 %v2655_v4  ;;  %2018 = vmatprep.subr.bf16.mxu1 %v2658_v49  ;;  %v2740_v4 = vld [vmem:[#allocation2 + $0x608] ss:$16 sps:$4 sm:$0xff]   ;;  %v2745_v49 = vld [vmem:[#allocation2 + $0x624] ss:$16 sps:$4 sm:$0xff]  }
  0xb0   :  { %1855 = vmatpush1.bf16.msra.mxu0 %v2653_v51  ;;  %2019 = vmatpush1.bf16.msra.mxu1 %v2656_v52  ;;  %v2748_v51 = vld [vmem:[#allocation2 + $0x62c] ss:$16 sps:$4 sm:$0xff]   ;;  %v227_v52 = vpack.c.b16 %v3023_v15, %v3023_v15 }
  0xb1   :  { %1856 = vmatprep.subr.bf16.mxu0 %v2661_v53  ;;  %2020 = vmatprep.subr.bf16.mxu1 %v2664_v20  ;;  %v2743_v53 = vld [vmem:[#allocation2 + $0x620] ss:$16 sps:$4 sm:$0xff]   ;;  %v2746_v20 = vld [vmem:[#allocation2 + $0x628] ss:$16 sps:$4 sm:$0xff]   ;;  %v2760_v15 = vld [vmem:[#allocation2 + $0x66c] ss:$16 sps:$4 sm:$0xff]  }
  0xb4   :  { %1857 = vmatpush1.bf16.msra.mxu0 %v2659_v54  ;;  %2021 = vmatpush1.bf16.msra.mxu1 %v2662_v55  ;;  %v2754_v54 = vld [vmem:[#allocation2 + $0x64c] ss:$16 sps:$4 sm:$0xff]   ;;  %v2749_v55 = vld [vmem:[#allocation2 + $0x640] ss:$16 sps:$4 sm:$0xff]  }
  0xb5   :  { %1858 = vmatprep.subr.bf16.mxu0 %v2667_v56  ;;  %2022 = vmatprep.subr.bf16.mxu1 %v2670_v57  ;;  %v2752_v56 = vld [vmem:[#allocation2 + $0x648] ss:$16 sps:$4 sm:$0xff]   ;;  %v2757_v57 = vld [vmem:[#allocation2 + $0x664] ss:$16 sps:$4 sm:$0xff]  }
  0xb8   :  { %1859 = vmatpush1.bf16.msra.mxu0 %v2665_v58  ;;  %2023 = vmatpush1.bf16.msra.mxu1 %v2668_v59  ;;  %v2755_v58 = vld [vmem:[#allocation2 + $0x660] ss:$16 sps:$4 sm:$0xff]   ;;  %v2758_v59 = vld [vmem:[#allocation2 + $0x668] ss:$16 sps:$4 sm:$0xff]  }
  0xb9   :  { %1860 = vmatprep.subr.bf16.mxu0 %v2673_v60  ;;  %2024 = vmatprep.subr.bf16.mxu1 %v2676_v61  ;;  %v2763_v60 = vld [vmem:[#allocation2 + $0x684] ss:$16 sps:$4 sm:$0xff]   ;;  %v2766_v61 = vld [vmem:[#allocation2 + $0x68c] ss:$16 sps:$4 sm:$0xff]  }
  0xbc   :  { %1861 = vmatpush1.bf16.msra.mxu0 %v2671_v62  ;;  %2025 = vmatpush1.bf16.msra.mxu1 %v2674_v63  ;;  %v2761_v62 = vld [vmem:[#allocation2 + $0x680] ss:$16 sps:$4 sm:$0xff]   ;;  %v2764_v63 = vld [vmem:[#allocation2 + $0x688] ss:$16 sps:$4 sm:$0xff]  }
  0xbd   :  { %1862 = vmatprep.subr.bf16.mxu0 %v2679_v0  ;;  %2026 = vmatprep.subr.bf16.mxu1 %v2682_v1  ;;  %v2769_v0 = vld [vmem:[#allocation2 + $0x6a4] ss:$16 sps:$4 sm:$0xff]   ;;  %v2772_v1 = vld [vmem:[#allocation2 + $0x6ac] ss:$16 sps:$4 sm:$0xff]  }
  0xc0   :  { %1863 = vmatpush1.bf16.msra.mxu0 %v2677_v50  ;;  %2027 = vmatpush1.bf16.msra.mxu1 %v2680_v2  ;;  %v2767_v50 = vld [vmem:[#allocation2 + $0x6a0] ss:$16 sps:$4 sm:$0xff]   ;;  %v2770_v2 = vld [vmem:[#allocation2 + $0x6a8] ss:$16 sps:$4 sm:$0xff]  }
  0xc1   :  { %1864 = vmatprep.subr.bf16.mxu0 %v2685_v3  ;;  %2028 = vmatprep.subr.bf16.mxu1 %v2688_v5  ;;  %v2775_v3 = vld [vmem:[#allocation2 + $0x6c4] ss:$16 sps:$4 sm:$0xff]   ;;  %v2778_v5 = vld [vmem:[#allocation2 + $0x6cc] ss:$16 sps:$4 sm:$0xff]  }
  0xc4   :  { %1865 = vmatpush1.bf16.msra.mxu0 %v2683_v6  ;;  %2029 = vmatpush1.bf16.msra.mxu1 %v2686_v7  ;;  %v2773_v6 = vld [vmem:[#allocation2 + $0x6c0] ss:$16 sps:$4 sm:$0xff]   ;;  %v2776_v7 = vld [vmem:[#allocation2 + $0x6c8] ss:$16 sps:$4 sm:$0xff]  }
  0xc5   :  { %1866 = vmatprep.subr.bf16.mxu0 %v2691_v8  ;;  %2030 = vmatprep.subr.bf16.mxu1 %v2694_v10  ;;  %v2781_v8 = vld [vmem:[#allocation2 + $0x6e4] ss:$16 sps:$4 sm:$0xff]   ;;  %v2784_v10 = vld [vmem:[#allocation2 + $0x6ec] ss:$16 sps:$4 sm:$0xff]  }
  0xc8   :  { %1867 = vmatpush1.bf16.msra.mxu0 %v2689_v11  ;;  %2031 = vmatpush1.bf16.msra.mxu1 %v2692_v12  ;;  %v2779_v11 = vld [vmem:[#allocation2 + $0x6e0] ss:$16 sps:$4 sm:$0xff]   ;;  %v2782_v12 = vld [vmem:[#allocation2 + $0x6e8] ss:$16 sps:$4 sm:$0xff]  }
  0xc9   :  { %1868 = vmatprep.subr.bf16.mxu0 %v2697_v16  ;;  %2032 = vmatprep.subr.bf16.mxu1 %v2700_v17  ;;  %v2787_v16 = vld [vmem:[#allocation2 + $0x704] ss:$16 sps:$4 sm:$0xff]   ;;  %v2790_v17 = vld [vmem:[#allocation2 + $0x70c] ss:$16 sps:$4 sm:$0xff]  }
  0xcc   :  { %1869 = vmatpush1.bf16.msra.mxu0 %v2695_v18  ;;  %2033 = vmatpush1.bf16.msra.mxu1 %v2698_v19  ;;  %v2785_v18 = vld [vmem:[#allocation2 + $0x700] ss:$16 sps:$4 sm:$0xff]   ;;  %v2788_v19 = vld [vmem:[#allocation2 + $0x708] ss:$16 sps:$4 sm:$0xff]  }
  0xcd   :  { %1870 = vmatprep.subr.bf16.mxu0 %v2703_v21  ;;  %2034 = vmatprep.subr.bf16.mxu1 %v2706_v22  ;;  %v2793_v21 = vld [vmem:[#allocation2 + $0x724] ss:$16 sps:$4 sm:$0xff]   ;;  %v2796_v22 = vld [vmem:[#allocation2 + $0x72c] ss:$16 sps:$4 sm:$0xff]  }
  0xd0   :  { %1871 = vmatpush1.bf16.msra.mxu0 %v2701_v23  ;;  %2035 = vmatpush1.bf16.msra.mxu1 %v2704_v24  ;;  %v2791_v23 = vld [vmem:[#allocation2 + $0x720] ss:$16 sps:$4 sm:$0xff]   ;;  %v2794_v24 = vld [vmem:[#allocation2 + $0x728] ss:$16 sps:$4 sm:$0xff]  }
  0xd1   :  { %1872 = vmatprep.subr.bf16.mxu0 %v2709_v25  ;;  %2036 = vmatprep.subr.bf16.mxu1 %v2712_v27  ;;  %v2799_v25 = vld [vmem:[#allocation2 + $0x744] ss:$16 sps:$4 sm:$0xff]   ;;  %v2802_v27 = vld [vmem:[#allocation2 + $0x74c] ss:$16 sps:$4 sm:$0xff]  }
  0xd4   :  { %1873 = vmatpush1.bf16.msra.mxu0 %v2707_v28  ;;  %2037 = vmatpush1.bf16.msra.mxu1 %v2710_v29  ;;  %v2797_v28 = vld [vmem:[#allocation2 + $0x740] ss:$16 sps:$4 sm:$0xff]   ;;  %v2800_v29 = vld [vmem:[#allocation2 + $0x748] ss:$16 sps:$4 sm:$0xff]  }
  0xd5   :  { %1874 = vmatprep.subr.bf16.mxu0 %v2715_v30  ;;  %2038 = vmatprep.subr.bf16.mxu1 %v2718_v31  ;;  %v2805_v30 = vld [vmem:[#allocation2 + $0x764] ss:$16 sps:$4 sm:$0xff]   ;;  %v2808_v31 = vld [vmem:[#allocation2 + $0x76c] ss:$16 sps:$4 sm:$0xff]  }
  0xd8   :  { %1875 = vmatpush1.bf16.msra.mxu0 %v2713_v32  ;;  %2039 = vmatpush1.bf16.msra.mxu1 %v2716_v33  ;;  %v2803_v32 = vld [vmem:[#allocation2 + $0x760] ss:$16 sps:$4 sm:$0xff]   ;;  %v2806_v33 = vld [vmem:[#allocation2 + $0x768] ss:$16 sps:$4 sm:$0xff]  }
  0xd9   :  { %1876 = vmatprep.subr.bf16.mxu0 %v2721_v34  ;;  %2040 = vmatprep.subr.bf16.mxu1 %v2724_v35  ;;  %v2811_v34 = vld [vmem:[#allocation2 + $0x784] ss:$16 sps:$4 sm:$0xff]   ;;  %v2814_v35 = vld [vmem:[#allocation2 + $0x78c] ss:$16 sps:$4 sm:$0xff]  }
  0xdc   :  { %1877 = vmatpush1.bf16.msra.mxu0 %v2719_v14  ;;  %2041 = vmatpush1.bf16.msra.mxu1 %v2722_v36  ;;  %v2809_v14 = vld [vmem:[#allocation2 + $0x780] ss:$16 sps:$4 sm:$0xff]   ;;  %v2812_v36 = vld [vmem:[#allocation2 + $0x788] ss:$16 sps:$4 sm:$0xff]  }
  0xdd   :  { %1878 = vmatprep.subr.bf16.mxu0 %v2727_v37  ;;  %2042 = vmatprep.subr.bf16.mxu1 %v2730_v38  ;;  %v2817_v37 = vld [vmem:[#allocation2 + $0x7a4] ss:$16 sps:$4 sm:$0xff]   ;;  %v2820_v38 = vld [vmem:[#allocation2 + $0x7ac] ss:$16 sps:$4 sm:$0xff]  }
  0xe0   :  { %1879 = vmatpush1.bf16.msra.mxu0 %v2725_v9  ;;  %2043 = vmatpush1.bf16.msra.mxu1 %v2728_v39  ;;  %v2815_v9 = vld [vmem:[#allocation2 + $0x7a0] ss:$16 sps:$4 sm:$0xff]   ;;  %v2818_v39 = vld [vmem:[#allocation2 + $0x7a8] ss:$16 sps:$4 sm:$0xff]  }
  0xe1   :  { %1880 = vmatprep.subr.bf16.mxu0 %v2733_v40  ;;  %2044 = vmatprep.subr.bf16.mxu1 %v2736_v41  ;;  %v2823_v40 = vld [vmem:[#allocation2 + $0x7c4] ss:$16 sps:$4 sm:$0xff]   ;;  %v2826_v41 = vld [vmem:[#allocation2 + $0x7cc] ss:$16 sps:$4 sm:$0xff]  }
  0xe4   :  { %1881 = vmatpush1.bf16.msra.mxu0 %v2731_v13  ;;  %2045 = vmatpush1.bf16.msra.mxu1 %v2734_v42  ;;  %v2821_v13 = vld [vmem:[#allocation2 + $0x7c0] ss:$16 sps:$4 sm:$0xff]   ;;  %v2824_v42 = vld [vmem:[#allocation2 + $0x7c8] ss:$16 sps:$4 sm:$0xff]  }
  0xe5   :  { %1891 = vmatprep.subr.bf16.mxu0 %v2739_v45  ;;  %2055 = vmatprep.subr.bf16.mxu1 %v2742_v46  ;;  %v2829_v45 = vld [vmem:[#allocation2 + $0x7e4] ss:$16 sps:$4 sm:$0xff]   ;;  %v2832_v46 = vld [vmem:[#allocation2 + $0x7ec] ss:$16 sps:$4 sm:$0xff]  }
  0xe7   :  { %1883 = vmatmul.mubr.bf16.vlgmr.msra.gmra.mrb[0].mxu0 %v224_v47  ;;  %2047 = vmatmul.mubr.bf16.vlgmr.msra.gmra.mrb[0].mxu1 %v224_v47  ;;  %v2827_v47 = vld [vmem:[#allocation2 + $0x7e0] ss:$16 sps:$4 sm:$0xff]  }
  0xe8   :  { %1892 = vmatpush1.bf16.msra.mxu0 %v2737_v48  ;;  %2056 = vmatpush1.bf16.msra.mxu1 %v2740_v4  ;;  %v2830_v48 = vld [vmem:[#allocation2 + $0x7e8] ss:$16 sps:$4 sm:$0xff]   ;;  %v226_v4 = vpack.c.b16 %v3026_v44, %v3026_v44 }
  0xe9   :  { %1893 = vmatprep.subr.bf16.mxu0 %v2745_v49  ;;  %2057 = vmatprep.subr.bf16.mxu1 %v2748_v51 }
  0xea   :  { %1923 = vmatprep.mubr.bf16.mxu0 %v227_v52  ;;  %2087 = vmatprep.mubr.bf16.mxu1 %v227_v52 }
  0xec   :  { %1894 = vmatpush1.bf16.msra.mxu0 %v2743_v53  ;;  %2058 = vmatpush1.bf16.msra.mxu1 %v2746_v20 }
  0xed   :  { %1895 = vmatprep.subr.bf16.mxu0 %v2751_v26  ;;  %2059 = vmatprep.subr.bf16.mxu1 %v2754_v54 }
  0xf0   :  { %1896 = vmatpush1.bf16.msra.mxu0 %v2749_v55  ;;  %2060 = vmatpush1.bf16.msra.mxu1 %v2752_v56 }
  0xf1   :  { %1897 = vmatprep.subr.bf16.mxu0 %v2757_v57  ;;  %2061 = vmatprep.subr.bf16.mxu1 %v2760_v15 }
  0xf4   :  { %1898 = vmatpush1.bf16.msra.mxu0 %v2755_v58  ;;  %2062 = vmatpush1.bf16.msra.mxu1 %v2758_v59 }
  0xf5   :  { %1899 = vmatprep.subr.bf16.mxu0 %v2763_v60  ;;  %2063 = vmatprep.subr.bf16.mxu1 %v2766_v61 }
  0xf8   :  { %1900 = vmatpush1.bf16.msra.mxu0 %v2761_v62  ;;  %2064 = vmatpush1.bf16.msra.mxu1 %v2764_v63 }
  0xf9   :  { %1901 = vmatprep.subr.bf16.mxu0 %v2769_v0  ;;  %2065 = vmatprep.subr.bf16.mxu1 %v2772_v1 }
  0xfc   :  { %1902 = vmatpush1.bf16.msra.mxu0 %v2767_v50  ;;  %2066 = vmatpush1.bf16.msra.mxu1 %v2770_v2  ;;  %v2925_v50 = vmov 1983009808  }
  0xfd   :  { %1903 = vmatprep.subr.bf16.mxu0 %v2775_v3  ;;  %2067 = vmatprep.subr.bf16.mxu1 %v2778_v5  ;;  %v2127_v2 = vunpack.c.l.s4 %v2925_v50 }
  0xff   :  { %v2128_v3 = vunpack.c.0.s8 %v2127_v2 }
 0x100   :  { %1904 = vmatpush1.bf16.msra.mxu0 %v2773_v6  ;;  %2068 = vmatpush1.bf16.msra.mxu1 %v2776_v7 }
 0x101   :  { %1905 = vmatprep.subr.bf16.mxu0 %v2781_v8  ;;  %2069 = vmatprep.subr.bf16.mxu1 %v2784_v10  ;;  %v2131_v7 = vsub.s32 %v2128_v3, %v2966_v43 }
 0x104   :  { %1906 = vmatpush1.bf16.msra.mxu0 %v2779_v11  ;;  %2070 = vmatpush1.bf16.msra.mxu1 %v2782_v12 }
 0x105   :  { %1907 = vmatprep.subr.bf16.mxu0 %v2787_v16  ;;  %2071 = vmatprep.subr.bf16.mxu1 %v2790_v17 }
 0x108   :  { %1908 = vmatpush1.bf16.msra.mxu0 %v2785_v18  ;;  %2072 = vmatpush1.bf16.msra.mxu1 %v2788_v19 }
 0x109   :  { %1909 = vmatprep.subr.bf16.mxu0 %v2793_v21  ;;  %2073 = vmatprep.subr.bf16.mxu1 %v2796_v22 }
 0x10c   :  { %1910 = vmatpush1.bf16.msra.mxu0 %v2791_v23  ;;  %2074 = vmatpush1.bf16.msra.mxu1 %v2794_v24 }
 0x10d   :  { %1911 = vmatprep.subr.bf16.mxu0 %v2799_v25  ;;  %2075 = vmatprep.subr.bf16.mxu1 %v2802_v27 }
 0x110   :  { %1912 = vmatpush1.bf16.msra.mxu0 %v2797_v28  ;;  %2076 = vmatpush1.bf16.msra.mxu1 %v2800_v29 }
 0x111   :  { %1913 = vmatprep.subr.bf16.mxu0 %v2805_v30  ;;  %2077 = vmatprep.subr.bf16.mxu1 %v2808_v31 }
 0x114   :  { %1914 = vmatpush1.bf16.msra.mxu0 %v2803_v32  ;;  %2078 = vmatpush1.bf16.msra.mxu1 %v2806_v33 }
 0x115   :  { %1915 = vmatprep.subr.bf16.mxu0 %v2811_v34  ;;  %2079 = vmatprep.subr.bf16.mxu1 %v2814_v35 }
 0x118   :  { %1916 = vmatpush1.bf16.msra.mxu0 %v2809_v14  ;;  %2080 = vmatpush1.bf16.msra.mxu1 %v2812_v36 }
 0x119   :  { %1917 = vmatprep.subr.bf16.mxu0 %v2817_v37  ;;  %2081 = vmatprep.subr.bf16.mxu1 %v2820_v38 }
 0x11c   :  { %1918 = vmatpush1.bf16.msra.mxu0 %v2815_v9  ;;  %2082 = vmatpush1.bf16.msra.mxu1 %v2818_v39 }
 0x11d   :  { %1919 = vmatprep.subr.bf16.mxu0 %v2823_v40  ;;  %2083 = vmatprep.subr.bf16.mxu1 %v2826_v41 }
 0x120   :  { %1920 = vmatpush1.bf16.msra.mxu0 %v2821_v13  ;;  %2084 = vmatpush1.bf16.msra.mxu1 %v2824_v42 }
 0x121   :  { %1921 = vmatprep.subr.bf16.mxu0 %v2829_v45  ;;  %2085 = vmatprep.subr.bf16.mxu1 %v2832_v46 }
 0x124   :  { %1922 = vmatpush1.bf16.msra.mxu0 %v2827_v47  ;;  %2086 = vmatpush1.bf16.msra.mxu1 %v2830_v48 }
 0x127   :  { %1924 = vmatmul.mubr.bf16.vlgmr.msra.gmra.mrb[0].mxu0 %v226_v4  ;;  %2088 = vmatmul.mubr.bf16.vlgmr.msra.gmra.mrb[0].mxu1 %v226_v4 }
 0x1fa   :  { %v1925_v49 = vpop.f32.mrb[0].mxu0  ;;  %v2089_v51 = vpop.f32.mrb[0].mxu1 }
 0x1fb   :  { %v2415_v52 = vmul.f32 -1.442695, %v1925_v49  ;;  %v2417_v53 = vmul.f32 -1.442695, %v2089_v51  ;;  %v1927_v20 = vpop.f32.mrb[1].mxu0  ;;  %v2091_v26 = vpop.f32.mrb[1].mxu1 }
 0x1fc   :  { %v2416_v54 = vmul.f32 -1.442695, %v1927_v20  ;;  %v2418_v55 = vmul.f32 -1.442695, %v2091_v26  ;;  %v1929_v56 = vpop.f32.mrb[2].mxu0  ;;  %v2093_v57 = vpop.f32.mrb[2].mxu1 }
 0x1fd   :  { %2833 = vpow2.f32 %v2415_v52  ;;  %v1930_v15 = vpop.f32.mrb[3].mxu0  ;;  %v2094_v58 = vpop.f32.mrb[3].mxu1 }
 0x1fe   :  { %2835 = vpow2.f32 %v2417_v53 }
 0x1ff   :  { %2837 = vpow2.f32 %v2416_v54 }
 0x200   :  { %2839 = vpow2.f32 %v2418_v55 }
 0x207   :  { %v2834_v44 = vpop.eup %2833 }
 0x208   :  { %v2836_v59 = vpop.eup %2835  ;;  %v2108_v60 = vadd.f32 1.0, %v2834_v44 }
 0x209   :  { %v2838_v61 = vpop.eup %2837  ;;  %v2110_v62 = vadd.f32 1.0, %v2836_v59 }
 0x20a   :  { %v2840_v63 = vpop.eup %2839  ;;  %2841 = vrcp.f32 %v2108_v60  ;;  %v2109_v0 = vadd.f32 1.0, %v2838_v61 }
 0x20b   :  { %2843 = vrcp.f32 %v2110_v62  ;;  %v2111_v1 = vadd.f32 1.0, %v2840_v63 }
 0x20c   :  { %2845 = vrcp.f32 %v2109_v0 }
 0x20d   :  { %2847 = vrcp.f32 %v2111_v1 }
 0x214   :  { %v2842_v5 = vpop.eup %2841 }
 0x215   :  { %v2844_v6 = vpop.eup %2843 }
 0x216   :  { %v2846_v8 = vpop.eup %2845 }
 0x217   :  { %v2848_v10 = vpop.eup %2847  ;;  %v2124_v11 = vcombine.low %v2842_v5, %v2846_v8 }
 0x218   :  { %v2125_v12 = vcombine.low %v2844_v6, %v2848_v10 }
 0x219   :  { %v2132_v16 = vrot.slane %v2124_v11, %v2131_v7 }
 0x21a   :  { %v2139_v17 = vrot.slane %v2125_v12, %v2131_v7 }
 0x21c   :  { %v2140_v18 = vcombine.low %v2132_v16, %v2139_v17 }
 0x21e   :  { %2142 = vst [vmem:[#allocation7] sm:$0xff] %v2140_v18 }
 0x21f   :  { %2904 = shalt.err (!%p2901_p6)
}
 0x220   :  { %s2905_s10 = scalar_lea.hbm %s3051_s2, 128 }
 0x221   :  { %p2906_p7 = scmp.ne.s32.totalorder %s3051_s2, %s2905_s10  ;;  %p2909_p8 = scmp.lt.u32.totalorder %s2905_s10, %s3051_s2 }
 0x223   :  { %p2911_p9 = pnand %p2909_p8, %p2906_p7 }
 0x225   :  { %2914 = shalt.err (!%p2911_p9)
}
 0x226   :  { %2152 = dma.vmem_to_hbm [thread:$0]  %s2150_s6, 128, %s3051_s2, [#allocation4]  }
 0x227   :  { %2919 = dma.done.wait [#allocation4], 128  }
 0x228   :  { %2920 = vsyncadd [#allocation4], 4294967168 }
 0x229   :  { %2156 = vsyncpa [#allocation3], 1 }
 0x22a   :  { %2157 = vsyncpa [#allocation6], 1 }
 0x22b   :  { %2158 = vsyncpa [#allocation4], 1 }

// kernel: tpu_custom_call.1
= control target key start
LH: loop header
LB: loop body
LE: loop exit
PB: predicated region body
PF: predicated region fallthrough
CT: control target
= control target key end

     0   :  { %7 = vsyncpa [#allocation3], 0  ;;  %s3049_s0 = inlined_call_operand.hbm [shape: bf16[1024,512], index: 0, kind: input, shape index: {}]   ;;  %s3050_s1 = inlined_call_operand.hbm [shape: f32[2,4,512], index: 1, kind: input, shape index: {}]   ;;  %s3051_s2 = inlined_call_operand.hbm [shape: f32[2,512], index: 2, kind: output, shape index: {}]  }
   0x1   :  { %8 = vsyncpa [#allocation6], 0 }
   0x2   :  { %9 = vsyncpa [#allocation4], 0  ;;  %s2921_s9 = smov [#allocation2]   ;;  %s2849_s13 = scalar_lea.hbm %s3049_s0, 32768 }
   0x3   :  { %s15_s10 = sshll.u32 %s2921_s9, 4  ;;  %p2850_p0 = scmp.ne.s32.totalorder %s3049_s0, %s2849_s13  ;;  %s16_s10 = int_to_ptr.vmem [resolvable:$true] %s15_s10 }
   0x4   :  { %p2853_p1 = scmp.lt.u32.totalorder %s2849_s13, %s3049_s0 }
   0x6   :  { %p2855_p2 = pnand %p2853_p1, %p2850_p0 }
   0x8   :  { %2858 = shalt.err (!%p2855_p2)
}
   0x9   :  { %s2859_s18 = scalar_lea.vmem %s16_s10, 32768  ;;  %p2864_p4 = scmp.lt.s32.totalorder %s16_s10, %s16_s10 }
   0xa   :  { %p2860_p3 = scmp.ne.s32.totalorder %s16_s10, %s2859_s18  ;;  %p2865_p5 = scmp.lt.s32.totalorder %s2859_s18, %s2859_s18 }
   0xc   :  { %p2866_p6 = por %p2865_p5, %p2864_p4 }
   0xe   :  { %p2867_p7 = pnand %p2866_p6, %p2860_p3 }
  0x10   :  { %2870 = shalt.err (!%p2867_p7)
}
  0x11   :  { %s2922_s19 = smov 256   ;;  %s2923_s20 = smov 16  }
  0x12   :  { %21 = dma.hbm_to_vmem [thread:$0]  %s3049_s0, 32768, %s16_s10, [#allocation3], %s2922_s19, %s2922_s19, %s2923_s20  }
  0x13   :  { %s2924_s23 = smov [#allocation5]   ;;  %s2871_s27 = scalar_lea.hbm %s3050_s1, 512 }
  0x14   :  { %s27_s24 = sshll.u32 %s2924_s23, 4  ;;  %p2872_p8 = scmp.ne.s32.totalorder %s3050_s1, %s2871_s27  ;;  %s28_s24 = int_to_ptr.vmem [resolvable:$true] %s27_s24 }
  0x15   :  { %p2875_p9 = scmp.lt.u32.totalorder %s2871_s27, %s3050_s1 }
  0x17   :  { %p2877_p10 = pnand %p2875_p9, %p2872_p8 }
  0x19   :  { %2880 = shalt.err (!%p2877_p10)
}
  0x1a   :  { %s2881_s4 = scalar_lea.vmem %s28_s24, 512  ;;  %p2886_p12 = scmp.lt.s32.totalorder %s28_s24, %s28_s24 }
  0x1b   :  { %p2882_p11 = scmp.ne.s32.totalorder %s28_s24, %s2881_s4  ;;  %p2887_p13 = scmp.lt.s32.totalorder %s2881_s4, %s2881_s4 }
  0x1d   :  { %p2888_p0 = por %p2887_p13, %p2886_p12 }
  0x1f   :  { %p2889_p1 = pnand %p2888_p0, %p2882_p11 }
  0x21   :  { %2892 = shalt.err (!%p2889_p1)
}
  0x22   :  { %33 = dma.hbm_to_vmem [thread:$0]  %s3050_s1, 512, %s28_s24, [#allocation6], %s2922_s19, %s2922_s19, %s2923_s20  }
  0x23   :  { %2915 = dma.done.wait [#allocation3], 32768  }
  0x24   :  { %2916 = vsyncadd [#allocation3], 4294934528 }
  0x25   :  { %2917 = dma.done.wait [#allocation6], 512  }
  0x26   :  { %2918 = vsyncadd [#allocation6], 4294966784  ;;  %v2449_v0 = vld [vmem:[#allocation2 + $0x4] ss:$16 sps:$4 sm:$0xff]   ;;  %v2451_v1 = vld [vmem:[#allocation2 + $0xc] ss:$16 sps:$4 sm:$0xff]   ;;  %v69_v38 = vlaneseq }
  0x27   :  { %1768 = vmatprep.subr.bf16.mxu0 %v2449_v0  ;;  %v2453_v2 = vld [vmem:[#allocation2] ss:$16 sps:$4 sm:$0xff]   ;;  %v2454_v3 = vld [vmem:[#allocation2 + $0x8] ss:$16 sps:$4 sm:$0xff]   ;;  %1932 = vmatprep.subr.bf16.mxu1 %v2451_v1  ;;  %v2455_v4 = vld [vmem:[#allocation2 + $0x24] ss:$16 sps:$4 sm:$0xff]  }
  0x28   :  { %1769 = vmatpush1.bf16.msra.mxu0 %v2453_v2  ;;  %1933 = vmatpush1.bf16.msra.mxu1 %v2454_v3  ;;  %v2457_v5 = vld [vmem:[#allocation2 + $0x2c] ss:$16 sps:$4 sm:$0xff]   ;;  %v2459_v6 = vld [vmem:[#allocation2 + $0x20] ss:$16 sps:$4 sm:$0xff]   ;;  %v2460_v7 = vld [vmem:[#allocation2 + $0x28] ss:$16 sps:$4 sm:$0xff]  }
  0x29   :  { %1770 = vmatprep.subr.bf16.mxu0 %v2455_v4  ;;  %1934 = vmatprep.subr.bf16.mxu1 %v2457_v5  ;;  %v2461_v8 = vld [vmem:[#allocation2 + $0x44] ss:$16 sps:$4 sm:$0xff]   ;;  %v2463_v9 = vld [vmem:[#allocation2 + $0x4c] ss:$16 sps:$4 sm:$0xff]   ;;  %v2465_v10 = vld [vmem:[#allocation2 + $0x40] ss:$16 sps:$4 sm:$0xff]  }
  0x2a   :  { %v2466_v11 = vld [vmem:[#allocation2 + $0x48] ss:$16 sps:$4 sm:$0xff]   ;;  %v2467_v12 = vld [vmem:[#allocation2 + $0x64] ss:$16 sps:$4 sm:$0xff]   ;;  %v2469_v13 = vld [vmem:[#allocation2 + $0x6c] ss:$16 sps:$4 sm:$0xff]  }
  0x2b   :  { %v2471_v14 = vld [vmem:[#allocation2 + $0x60] ss:$16 sps:$4 sm:$0xff]   ;;  %v2472_v15 = vld [vmem:[#allocation2 + $0x68] ss:$16 sps:$4 sm:$0xff]   ;;  %v2473_v16 = vld [vmem:[#allocation2 + $0x84] ss:$16 sps:$4 sm:$0xff]  }
  0x2c   :  { %1771 = vmatpush1.bf16.msra.mxu0 %v2459_v6  ;;  %1935 = vmatpush1.bf16.msra.mxu1 %v2460_v7  ;;  %v2475_v17 = vld [vmem:[#allocation2 + $0x8c] ss:$16 sps:$4 sm:$0xff]   ;;  %v2477_v18 = vld [vmem:[#allocation2 + $0x80] ss:$16 sps:$4 sm:$0xff]   ;;  %v2478_v19 = vld [vmem:[#allocation2 + $0x88] ss:$16 sps:$4 sm:$0xff]  }
  0x2d   :  { %1772 = vmatprep.subr.bf16.mxu0 %v2461_v8  ;;  %1936 = vmatprep.subr.bf16.mxu1 %v2463_v9  ;;  %v2479_v20 = vld [vmem:[#allocation2 + $0xa4] ss:$16 sps:$4 sm:$0xff]   ;;  %v2481_v21 = vld [vmem:[#allocation2 + $0xac] ss:$16 sps:$4 sm:$0xff]   ;;  %v2483_v22 = vld [vmem:[#allocation2 + $0xa0] ss:$16 sps:$4 sm:$0xff]  }
  0x2e   :  { %v2484_v23 = vld [vmem:[#allocation2 + $0xa8] ss:$16 sps:$4 sm:$0xff]   ;;  %v2485_v24 = vld [vmem:[#allocation2 + $0xc4] ss:$16 sps:$4 sm:$0xff]   ;;  %v2487_v25 = vld [vmem:[#allocation2 + $0xcc] ss:$16 sps:$4 sm:$0xff]  }
  0x2f   :  { %v2489_v26 = vld [vmem:[#allocation2 + $0xc0] ss:$16 sps:$4 sm:$0xff]   ;;  %v2490_v27 = vld [vmem:[#allocation2 + $0xc8] ss:$16 sps:$4 sm:$0xff]   ;;  %v2491_v28 = vld [vmem:[#allocation2 + $0xe4] ss:$16 sps:$4 sm:$0xff]  }
  0x30   :  { %1773 = vmatpush1.bf16.msra.mxu0 %v2465_v10  ;;  %1937 = vmatpush1.bf16.msra.mxu1 %v2466_v11  ;;  %v2493_v29 = vld [vmem:[#allocation2 + $0xec] ss:$16 sps:$4 sm:$0xff]   ;;  %v2495_v30 = vld [vmem:[#allocation2 + $0xe0] ss:$16 sps:$4 sm:$0xff]   ;;  %v2496_v31 = vld [vmem:[#allocation2 + $0xe8] ss:$16 sps:$4 sm:$0xff]  }
  0x31   :  { %1774 = vmatprep.subr.bf16.mxu0 %v2467_v12  ;;  %1938 = vmatprep.subr.bf16.mxu1 %v2469_v13  ;;  %v2497_v32 = vld [vmem:[#allocation2 + $0x104] ss:$16 sps:$4 sm:$0xff]   ;;  %v2499_v33 = vld [vmem:[#allocation2 + $0x10c] ss:$16 sps:$4 sm:$0xff]   ;;  %v2501_v34 = vld [vmem:[#allocation2 + $0x100] ss:$16 sps:$4 sm:$0xff]  }
  0x32   :  { %v2502_v35 = vld [vmem:[#allocation2 + $0x108] ss:$16 sps:$4 sm:$0xff]   ;;  %v2503_v36 = vld [vmem:[#allocation2 + $0x124] ss:$16 sps:$4 sm:$0xff]   ;;  %v2505_v37 = vld [vmem:[#allocation2 + $0x12c] ss:$16 sps:$4 sm:$0xff]  }
  0x33   :  { %v2507_v39 = vld [vmem:[#allocation2 + $0x120] ss:$16 sps:$4 sm:$0xff]   ;;  %v2508_v40 = vld [vmem:[#allocation2 + $0x128] ss:$16 sps:$4 sm:$0xff]   ;;  %v2509_v41 = vld [vmem:[#allocation2 + $0x144] ss:$16 sps:$4 sm:$0xff]  }
  0x34   :  { %1775 = vmatpush1.bf16.msra.mxu0 %v2471_v14  ;;  %1939 = vmatpush1.bf16.msra.mxu1 %v2472_v15  ;;  %v2511_v42 = vld [vmem:[#allocation2 + $0x14c] ss:$16 sps:$4 sm:$0xff]   ;;  %v2966_v43 = vshrl.u32 %v69_v38, 7  ;;  %v2513_v44 = vld [vmem:[#allocation2 + $0x140] ss:$16 sps:$4 sm:$0xff]   ;;  %vm184_vm0 = vcmask 1041409  }
  0x35   :  { %1776 = vmatprep.subr.bf16.mxu0 %v2473_v16  ;;  %1940 = vmatprep.subr.bf16.mxu1 %v2475_v17  ;;  %v2514_v45 = vld [vmem:[#allocation2 + $0x148] ss:$16 sps:$4 sm:$0xff]   ;;  %v2515_v46 = vld [vmem:[#allocation2 + $0x164] ss:$16 sps:$4 sm:$0xff]   ;;  %v2517_v47 = vld [vmem:[#allocation2 + $0x16c] ss:$16 sps:$4 sm:$0xff]  }
  0x36   :  { %v2519_v48 = vld [vmem:[#allocation2 + $0x160] ss:$16 sps:$4 sm:$0xff]   ;;  %v2520_v49 = vld [vmem:[#allocation2 + $0x168] ss:$16 sps:$4 sm:$0xff]   ;;  %v2969_v50 = vsub.s32 1, %v2966_v43  ;;  %v2972_v6 = vsub.s32 0, %v2966_v43 }
  0x37   :  { %v2521_v51 = vld [vmem:[#allocation2 + $0x184] ss:$16 sps:$4 sm:$0xff]   ;;  %v2523_v52 = vld [vmem:[#allocation2 + $0x18c] ss:$16 sps:$4 sm:$0xff]   ;;  %v2525_v1 = vld [vmem:[#allocation2 + $0x180] ss:$16 sps:$4 sm:$0xff]  }
  0x38   :  { %1777 = vmatpush1.bf16.msra.mxu0 %v2477_v18  ;;  %1941 = vmatpush1.bf16.msra.mxu1 %v2478_v19  ;;  %v40_v53 = vld [vmem:[#allocation5] ss:$4 sm:$0xf]  ;;  %v42_v54 = vld [vmem:[#allocation5 + $0x10] ss:$4 sm:$0xf] }
  0x39   :  { %1778 = vmatprep.subr.bf16.mxu0 %v2479_v20  ;;  %1942 = vmatprep.subr.bf16.mxu1 %v2481_v21  ;;  %v44_v55 = vld [vmem:[#allocation5 + $0x1] ss:$4 sm:$0xf]  ;;  %v46_v56 = vld [vmem:[#allocation5 + $0x11] ss:$4 sm:$0xf] }
  0x3a   :  { %v47_v57 = vadd.f32 %v44_v55, %v40_v53  ;;  %v48_v58 = vadd.f32 %v46_v56, %v42_v54  ;;  %v49_v59 = vmax.f32 %v40_v53, %v44_v55  ;;  %v52_v60 = vld [vmem:[#allocation5 + $0x2] ss:$4 sm:$0xf]  ;;  %v54_v61 = vld [vmem:[#allocation5 + $0x12] ss:$4 sm:$0xf]  ;;  %v50_v62 = vmax.f32 %v42_v54, %v46_v56 }
  0x3b   :  { %v60_v63 = vld [vmem:[#allocation5 + $0x3] ss:$4 sm:$0xf]  ;;  %v62_v0 = vld [vmem:[#allocation5 + $0x13] ss:$4 sm:$0xf] }
  0x3c   :  { %1779 = vmatpush1.bf16.msra.mxu0 %v2483_v22  ;;  %1943 = vmatpush1.bf16.msra.mxu1 %v2484_v23  ;;  %v2526_v2 = vld [vmem:[#allocation2 + $0x188] ss:$16 sps:$4 sm:$0xff]   ;;  %v55_v3 = vadd.f32 %v52_v60, %v47_v57  ;;  %v56_v4 = vadd.f32 %v54_v61, %v48_v58  ;;  %v57_v5 = vmax.f32 %v49_v59, %v52_v60  ;;  %v2527_v7 = vld [vmem:[#allocation2 + $0x1a4] ss:$16 sps:$4 sm:$0xff]   ;;  %v2975_v9 = vsub.s32 3, %v2966_v43  ;;  %s2926_s1 = smov [#allocation7]  }
  0x3d   :  { %1780 = vmatprep.subr.bf16.mxu0 %v2485_v24  ;;  %1944 = vmatprep.subr.bf16.mxu1 %v2487_v25  ;;  %v58_v8 = vmax.f32 %v50_v62, %v54_v61  ;;  %v2529_v10 = vld [vmem:[#allocation2 + $0x1ac] ss:$16 sps:$4 sm:$0xff]   ;;  %v2982_v15 = vsub.s32 2, %v2966_v43  ;;  %v2531_v16 = vld [vmem:[#allocation2 + $0x1a0] ss:$16 sps:$4 sm:$0xff]   ;;  %s2149_s6 = sshll.u32 %s2926_s1, 4  ;;  %s2150_s6 = int_to_ptr.vmem [resolvable:$true] %s2149_s6 }
  0x3e   :  { %v63_v11 = vadd.f32 %v60_v63, %v55_v3  ;;  %v64_v12 = vadd.f32 %v62_v0, %v56_v4  ;;  %v2977_v13 = vmax.f32 %v57_v5, %v60_v63  ;;  %v2532_v17 = vld [vmem:[#allocation2 + $0x1a8] ss:$16 sps:$4 sm:$0xff]   ;;  %v2533_v22 = vld [vmem:[#allocation2 + $0x1c4] ss:$16 sps:$4 sm:$0xff]   ;;  %v2543_v55 = vld [vmem:[#allocation2 + $0x1e0] ss:$16 sps:$4 sm:$0xff]   ;;  %p2898_p3 = scmp.lt.s32.totalorder %s2150_s6, %s2150_s6 }
  0x3f   :  { %v2979_v14 = vmax.f32 %v58_v8, %v62_v0  ;;  %v2544_v56 = vld [vmem:[#allocation2 + $0x1e8] ss:$16 sps:$4 sm:$0xff]   ;;  %v2547_v62 = vld [vmem:[#allocation2 + $0x204] ss:$16 sps:$4 sm:$0xff]   ;;  %s2893_s7 = scalar_lea.vmem %s2150_s6, 128 }
  0x40   :  { %1781 = vmatpush1.bf16.msra.mxu0 %v2489_v26  ;;  %1945 = vmatpush1.bf16.msra.mxu1 %v2490_v27  ;;  %v76_v18 = vrot.slane %v63_v11, %v2969_v50  ;;  %v92_v19 = vrot.slane %v64_v12, %v2969_v50  ;;  %v72_v20 = vrot.slane %v63_v11, %v2972_v6  ;;  %v2535_v26 = vld [vmem:[#allocation2 + $0x1cc] ss:$16 sps:$4 sm:$0xff]   ;;  %v2548_v8 = vld [vmem:[#allocation2 + $0x208] ss:$16 sps:$4 sm:$0xff]   ;;  %p2894_p2 = scmp.ne.s32.totalorder %s2150_s6, %s2893_s7  ;;  %p2899_p4 = scmp.lt.s32.totalorder %s2893_s7, %s2893_s7 }
  0x41   :  { %1782 = vmatprep.subr.bf16.mxu0 %v2491_v28  ;;  %1946 = vmatprep.subr.bf16.mxu1 %v2493_v29  ;;  %v88_v21 = vrot.slane %v64_v12, %v2972_v6  ;;  %v84_v23 = vrot.slane %v63_v11, %v2975_v9  ;;  %v100_v24 = vrot.slane %v64_v12, %v2975_v9 }
  0x42   :  { %v80_v25 = vrot.slane %v63_v11, %v2982_v15  ;;  %v110_v27 = vpack.c.bf16 %v76_v18, %v76_v18  ;;  %v114_v28 = vpack.c.bf16 %v92_v19, %v92_v19  ;;  %v109_v29 = vpack.c.bf16 %v72_v20, %v72_v20  ;;  %v2556_v19 = vld [vmem:[#allocation2 + $0x22c] ss:$16 sps:$4 sm:$0xff]   ;;  %p2900_p5 = por %p2899_p4, %p2898_p3 }
  0x43   :  { %v126_v54 = vrot.slane %v2977_v13, %v2969_v50  ;;  %v122_v60 = vrot.slane %v2977_v13, %v2972_v6 }
  0x44   :  { %1783 = vmatpush1.bf16.msra.mxu0 %v2495_v30  ;;  %1947 = vmatpush1.bf16.msra.mxu1 %v2496_v31  ;;  %v113_v30 = vpack.c.bf16 %v88_v21, %v88_v21  ;;  %v112_v31 = vpack.c.bf16 %v84_v23, %v84_v23  ;;  %v111_v38 = vpack.c.bf16 %v80_v25, %v80_v25  ;;  %v2551_v23 = vld [vmem:[#allocation2 + $0x220] ss:$16 sps:$4 sm:$0xff]   ;;  %v2559_v25 = vld [vmem:[#allocation2 + $0x244] ss:$16 sps:$4 sm:$0xff]   ;;  %p2901_p6 = pnand %p2900_p5, %p2894_p2 }
  0x45   :  { %1784 = vmatprep.subr.bf16.mxu0 %v2497_v32  ;;  %1948 = vmatprep.subr.bf16.mxu1 %v2499_v33  ;;  %v116_v32 = vpack.c.bf16 %v100_v24, %v100_v24  ;;  %v96_v33 = vrot.slane %v64_v12, %v2982_v15  ;;  %v159_v3 = vpack.c.bf16 %v122_v60, %v122_v60  ;;  %v2554_v24 = vld [vmem:[#allocation2 + $0x228] ss:$16 sps:$4 sm:$0xff]   ;;  %v2607_v60 = vld [vmem:[#allocation2 + $0x344] ss:$16 sps:$4 sm:$0xff]  }
  0x48   :  { %1785 = vmatpush1.bf16.msra.mxu0 %v2501_v34  ;;  %1949 = vmatpush1.bf16.msra.mxu1 %v2502_v35  ;;  %v2537_v34 = vld [vmem:[#allocation2 + $0x1c0] ss:$16 sps:$4 sm:$0xff]   ;;  %v2538_v35 = vld [vmem:[#allocation2 + $0x1c8] ss:$16 sps:$4 sm:$0xff]  }
  0x49   :  { %1786 = vmatprep.subr.bf16.mxu0 %v2503_v36  ;;  %1950 = vmatprep.subr.bf16.mxu1 %v2505_v37  ;;  %v176_v36 = vunpack.c.l.b16 %v110_v27  ;;  %v180_v37 = vunpack.c.l.b16 %v114_v28  ;;  %v2562_v27 = vld [vmem:[#allocation2 + $0x24c] ss:$16 sps:$4 sm:$0xff]   ;;  %v2557_v28 = vld [vmem:[#allocation2 + $0x240] ss:$16 sps:$4 sm:$0xff]  }
  0x4c   :  { %1787 = vmatpush1.bf16.msra.mxu0 %v2507_v39  ;;  %1951 = vmatpush1.bf16.msra.mxu1 %v2508_v40  ;;  %v2539_v39 = vld [vmem:[#allocation2 + $0x1e4] ss:$16 sps:$4 sm:$0xff]   ;;  %v175_v40 = vunpack.c.l.b16 %v109_v29  ;;  %v2560_v29 = vld [vmem:[#allocation2 + $0x248] ss:$16 sps:$4 sm:$0xff]  }
  0x4d   :  { %1788 = vmatprep.subr.bf16.mxu0 %v2509_v41  ;;  %1952 = vmatprep.subr.bf16.mxu1 %v2511_v42  ;;  %v179_v41 = vunpack.c.l.b16 %v113_v30  ;;  %v182_v42 = vunpack.c.l.b16 %v116_v32  ;;  %v2565_v30 = vld [vmem:[#allocation2 + $0x264] ss:$16 sps:$4 sm:$0xff]   ;;  %v2563_v32 = vld [vmem:[#allocation2 + $0x260] ss:$16 sps:$4 sm:$0xff]  }
  0x4f   :  { %v190_v58 = vrot.slane %v182_v42, 7  ;;  %v2583_v42 = vld [vmem:[#allocation2 + $0x2c4] ss:$16 sps:$4 sm:$0xff]  }
  0x50   :  { %1789 = vmatpush1.bf16.msra.mxu0 %v2513_v44  ;;  %1953 = vmatpush1.bf16.msra.mxu1 %v2514_v45  ;;  %v115_v44 = vpack.c.bf16 %v96_v33, %v96_v33  ;;  %v2541_v45 = vld [vmem:[#allocation2 + $0x1ec] ss:$16 sps:$4 sm:$0xff]   ;;  %v2566_v33 = vld [vmem:[#allocation2 + $0x268] ss:$16 sps:$4 sm:$0xff]  }
  0x51   :  { %1790 = vmatprep.subr.bf16.mxu0 %v2515_v46  ;;  %1954 = vmatprep.subr.bf16.mxu1 %v2517_v47  ;;  %v186_v46 = vrot.slane %v180_v37, 7  ;;  %v178_v47 = vunpack.c.l.b16 %v112_v31  ;;  %v2568_v31 = vld [vmem:[#allocation2 + $0x26c] ss:$16 sps:$4 sm:$0xff]   ;;  %v2572_v37 = vld [vmem:[#allocation2 + $0x288] ss:$16 sps:$4 sm:$0xff]  }
  0x52   :  { %v181_v53 = vunpack.c.l.b16 %v115_v44  ;;  %v2586_v44 = vld [vmem:[#allocation2 + $0x2cc] ss:$16 sps:$4 sm:$0xff]  }
  0x53   :  { %v187_v57 = vsel %vm184_vm0, %v186_v46, %v176_v36  ;;  %v191_v11 = vsel %vm184_vm0, %v190_v58, %v178_v47  ;;  %v2569_v36 = vld [vmem:[#allocation2 + $0x280] ss:$16 sps:$4 sm:$0xff]   ;;  %v2584_v46 = vld [vmem:[#allocation2 + $0x2c8] ss:$16 sps:$4 sm:$0xff]   ;;  %v2589_v47 = vld [vmem:[#allocation2 + $0x2e4] ss:$16 sps:$4 sm:$0xff]  }
  0x54   :  { %1791 = vmatpush1.bf16.msra.mxu0 %v2519_v48  ;;  %1955 = vmatpush1.bf16.msra.mxu1 %v2520_v49  ;;  %v142_v48 = vrot.slane %v2979_v14, %v2969_v50  ;;  %v138_v49 = vrot.slane %v2979_v14, %v2972_v6  ;;  %v193_v61 = vpack.c.b16 %v187_v57, %v187_v57  ;;  %v188_v0 = vrot.slane %v181_v53, 7  ;;  %v2550_v50 = vld [vmem:[#allocation2 + $0x20c] ss:$16 sps:$4 sm:$0xff]   ;;  %v2599_v58 = vld [vmem:[#allocation2 + $0x320] ss:$16 sps:$4 sm:$0xff]  }
  0x55   :  { %1792 = vmatprep.subr.bf16.mxu0 %v2521_v51  ;;  %1956 = vmatprep.subr.bf16.mxu1 %v2523_v52  ;;  %v183_v51 = vrot.slane %v179_v41, 7  ;;  %v177_v52 = vunpack.c.l.b16 %v111_v38  ;;  %v195_v21 = vpack.c.b16 %v191_v11, %v191_v11  ;;  %v2577_v38 = vld [vmem:[#allocation2 + $0x2a4] ss:$16 sps:$4 sm:$0xff]   ;;  %v2578_v41 = vld [vmem:[#allocation2 + $0x2a8] ss:$16 sps:$4 sm:$0xff]  }
  0x56   :  { %v164_v59 = vpack.c.bf16 %v142_v48, %v142_v48  ;;  %1800 = vmatprep.mubr.bf16.mxu0 %v193_v61  ;;  %1964 = vmatprep.mubr.bf16.mxu1 %v193_v61  ;;  %v163_v6 = vpack.c.bf16 %v138_v49, %v138_v49  ;;  %v2592_v48 = vld [vmem:[#allocation2 + $0x2ec] ss:$16 sps:$4 sm:$0xff]   ;;  %v2587_v49 = vld [vmem:[#allocation2 + $0x2e0] ss:$16 sps:$4 sm:$0xff]  }
  0x57   :  { %v185_v63 = vsel %vm184_vm0, %v183_v51, %v175_v40  ;;  %v3003_v4 = vsel %vm184_vm0, %v188_v0, %v177_v52  ;;  %v2575_v40 = vld [vmem:[#allocation2 + $0x2a0] ss:$16 sps:$4 sm:$0xff]   ;;  %v2590_v51 = vld [vmem:[#allocation2 + $0x2e8] ss:$16 sps:$4 sm:$0xff]   ;;  %v2595_v52 = vld [vmem:[#allocation2 + $0x304] ss:$16 sps:$4 sm:$0xff]  }
  0x58   :  { %1793 = vmatpush1.bf16.msra.mxu0 %v2525_v1  ;;  %1957 = vmatpush1.bf16.msra.mxu1 %v2526_v2  ;;  %v160_v1 = vpack.c.bf16 %v126_v54, %v126_v54  ;;  %v213_v2 = vunpack.c.l.b16 %v164_v59  ;;  %v212_v18 = vunpack.c.l.b16 %v163_v6  ;;  %v2598_v53 = vld [vmem:[#allocation2 + $0x30c] ss:$16 sps:$4 sm:$0xff]   ;;  %v2593_v54 = vld [vmem:[#allocation2 + $0x300] ss:$16 sps:$4 sm:$0xff]   ;;  %v2602_v59 = vld [vmem:[#allocation2 + $0x328] ss:$16 sps:$4 sm:$0xff]  }
  0x59   :  { %1794 = vmatprep.subr.bf16.mxu0 %v2527_v7  ;;  %1958 = vmatprep.subr.bf16.mxu1 %v2529_v10  ;;  %v2545_v7 = vld [vmem:[#allocation2 + $0x200] ss:$16 sps:$4 sm:$0xff]   ;;  %v192_v10 = vpack.c.b16 %v185_v63, %v185_v63  ;;  %v2604_v57 = vld [vmem:[#allocation2 + $0x32c] ss:$16 sps:$4 sm:$0xff]   ;;  %v2608_v63 = vld [vmem:[#allocation2 + $0x348] ss:$16 sps:$4 sm:$0xff]  }
  0x5a   :  { %v209_v5 = vunpack.c.l.b16 %v160_v1  ;;  %v218_v12 = vrot.slane %v213_v2, 7  ;;  %v2610_v61 = vld [vmem:[#allocation2 + $0x34c] ss:$16 sps:$4 sm:$0xff]   ;;  %v2613_v0 = vld [vmem:[#allocation2 + $0x364] ss:$16 sps:$4 sm:$0xff]  }
  0x5b   :  { %v2616_v1 = vld [vmem:[#allocation2 + $0x36c] ss:$16 sps:$4 sm:$0xff]   ;;  %v2614_v2 = vld [vmem:[#allocation2 + $0x368] ss:$16 sps:$4 sm:$0xff]   ;;  %v2617_v6 = vld [vmem:[#allocation2 + $0x380] ss:$16 sps:$4 sm:$0xff]  }
  0x5c   :  { %1795 = vmatpush1.bf16.msra.mxu0 %v2531_v16  ;;  %1959 = vmatpush1.bf16.msra.mxu1 %v2532_v17  ;;  %v2553_v16 = vld [vmem:[#allocation2 + $0x224] ss:$16 sps:$4 sm:$0xff]   ;;  %v208_v17 = vunpack.c.l.b16 %v159_v3  ;;  %v3007_v20 = vsel %vm184_vm0, %v218_v12, %v209_v5  ;;  %v2622_v5 = vld [vmem:[#allocation2 + $0x38c] ss:$16 sps:$4 sm:$0xff]   ;;  %v2623_v11 = vld [vmem:[#allocation2 + $0x3a0] ss:$16 sps:$4 sm:$0xff]  }
  0x5d   :  { %1796 = vmatprep.subr.bf16.mxu0 %v2533_v22  ;;  %1960 = vmatprep.subr.bf16.mxu1 %v2535_v26  ;;  %v216_v22 = vrot.slane %v212_v18, 7  ;;  %v2619_v3 = vld [vmem:[#allocation2 + $0x384] ss:$16 sps:$4 sm:$0xff]   ;;  %v2626_v12 = vld [vmem:[#allocation2 + $0x3a8] ss:$16 sps:$4 sm:$0xff]  }
  0x5e   :  { %v2629_v18 = vld [vmem:[#allocation2 + $0x3c0] ss:$16 sps:$4 sm:$0xff]  }
  0x5f   :  { %v3010_v26 = vsel %vm184_vm0, %v216_v22, %v208_v17  ;;  %v2634_v17 = vld [vmem:[#allocation2 + $0x3cc] ss:$16 sps:$4 sm:$0xff]   ;;  %v2637_v22 = vld [vmem:[#allocation2 + $0x3e4] ss:$16 sps:$4 sm:$0xff]  }
  0x60   :  { %1797 = vmatpush1.bf16.msra.mxu0 %v2537_v34  ;;  %1961 = vmatpush1.bf16.msra.mxu1 %v2538_v35  ;;  %v2571_v34 = vld [vmem:[#allocation2 + $0x284] ss:$16 sps:$4 sm:$0xff]   ;;  %v2574_v35 = vld [vmem:[#allocation2 + $0x28c] ss:$16 sps:$4 sm:$0xff]  }
  0x61   :  { %1798 = vmatprep.subr.bf16.mxu0 %v2539_v39  ;;  %1962 = vmatprep.subr.bf16.mxu1 %v2541_v45  ;;  %v2580_v39 = vld [vmem:[#allocation2 + $0x2ac] ss:$16 sps:$4 sm:$0xff]   ;;  %v2581_v45 = vld [vmem:[#allocation2 + $0x2c0] ss:$16 sps:$4 sm:$0xff]  }
  0x64   :  { %1799 = vmatpush1.bf16.msra.mxu0 %v2543_v55  ;;  %1963 = vmatpush1.bf16.msra.mxu1 %v2544_v56  ;;  %v2596_v55 = vld [vmem:[#allocation2 + $0x308] ss:$16 sps:$4 sm:$0xff]   ;;  %v2601_v56 = vld [vmem:[#allocation2 + $0x324] ss:$16 sps:$4 sm:$0xff]  }
  0x65   :  { %1809 = vmatprep.subr.bf16.mxu0 %v2547_v62  ;;  %1973 = vmatprep.subr.bf16.mxu1 %v2550_v50  ;;  %v2605_v62 = vld [vmem:[#allocation2 + $0x340] ss:$16 sps:$4 sm:$0xff]  }
  0x66   :  { %v2611_v50 = vld [vmem:[#allocation2 + $0x360] ss:$16 sps:$4 sm:$0xff]  }
  0x67   :  { %1801 = vmatmul.mubr.bf16.vlgmr.msra.gmra.mrb[0].mxu0 %v192_v10  ;;  %1965 = vmatmul.mubr.bf16.vlgmr.msra.gmra.mrb[0].mxu1 %v192_v10  ;;  %v2628_v10 = vld [vmem:[#allocation2 + $0x3ac] ss:$16 sps:$4 sm:$0xff]  }
  0x68   :  { %1810 = vmatpush1.bf16.msra.mxu0 %v2545_v7  ;;  %1974 = vmatpush1.bf16.msra.mxu1 %v2548_v8  ;;  %v2620_v7 = vld [vmem:[#allocation2 + $0x388] ss:$16 sps:$4 sm:$0xff]   ;;  %v2625_v8 = vld [vmem:[#allocation2 + $0x3a4] ss:$16 sps:$4 sm:$0xff]  }
  0x69   :  { %1811 = vmatprep.subr.bf16.mxu0 %v2553_v16  ;;  %1975 = vmatprep.subr.bf16.mxu1 %v2556_v19  ;;  %v2631_v16 = vld [vmem:[#allocation2 + $0x3c4] ss:$16 sps:$4 sm:$0xff]   ;;  %v2632_v19 = vld [vmem:[#allocation2 + $0x3c8] ss:$16 sps:$4 sm:$0xff]  }
  0x6a   :  { %1841 = vmatprep.mubr.bf16.mxu0 %v195_v21  ;;  %2005 = vmatprep.mubr.bf16.mxu1 %v195_v21  ;;  %v150_v21 = vrot.slane %v2979_v14, %v2975_v9 }
  0x6c   :  { %1812 = vmatpush1.bf16.msra.mxu0 %v2551_v23  ;;  %1976 = vmatpush1.bf16.msra.mxu1 %v2554_v24  ;;  %v146_v23 = vrot.slane %v2979_v14, %v2982_v15  ;;  %v2640_v24 = vld [vmem:[#allocation2 + $0x3ec] ss:$16 sps:$4 sm:$0xff]  }
  0x6d   :  { %1813 = vmatprep.subr.bf16.mxu0 %v2559_v25  ;;  %1977 = vmatprep.subr.bf16.mxu1 %v2562_v27  ;;  %v134_v25 = vrot.slane %v2977_v13, %v2975_v9  ;;  %v166_v27 = vpack.c.bf16 %v150_v21, %v150_v21  ;;  %v2703_v21 = vld [vmem:[#allocation2 + $0x544] ss:$16 sps:$4 sm:$0xff]  }
  0x70   :  { %1814 = vmatpush1.bf16.msra.mxu0 %v2557_v28  ;;  %1978 = vmatpush1.bf16.msra.mxu1 %v2560_v29  ;;  %v130_v28 = vrot.slane %v2977_v13, %v2982_v15  ;;  %v165_v29 = vpack.c.bf16 %v146_v23, %v146_v23  ;;  %v194_v13 = vpack.c.b16 %v3003_v4, %v3003_v4  ;;  %v2655_v4 = vld [vmem:[#allocation2 + $0x444] ss:$16 sps:$4 sm:$0xff]   ;;  %v2701_v23 = vld [vmem:[#allocation2 + $0x540] ss:$16 sps:$4 sm:$0xff]  }
  0x71   :  { %1815 = vmatprep.subr.bf16.mxu0 %v2565_v30  ;;  %1979 = vmatprep.subr.bf16.mxu1 %v2568_v31  ;;  %v2635_v30 = vld [vmem:[#allocation2 + $0x3e0] ss:$16 sps:$4 sm:$0xff]   ;;  %v2638_v31 = vld [vmem:[#allocation2 + $0x3e8] ss:$16 sps:$4 sm:$0xff]  }
  0x72   :  { %v214_v14 = vunpack.c.l.b16 %v165_v29  ;;  %v2710_v29 = vld [vmem:[#allocation2 + $0x568] ss:$16 sps:$4 sm:$0xff]  }
  0x74   :  { %1816 = vmatpush1.bf16.msra.mxu0 %v2563_v32  ;;  %1980 = vmatpush1.bf16.msra.mxu1 %v2566_v33  ;;  %v162_v32 = vpack.c.bf16 %v134_v25, %v134_v25  ;;  %v215_v33 = vunpack.c.l.b16 %v166_v27  ;;  %v2709_v25 = vld [vmem:[#allocation2 + $0x564] ss:$16 sps:$4 sm:$0xff]   ;;  %v2712_v27 = vld [vmem:[#allocation2 + $0x56c] ss:$16 sps:$4 sm:$0xff]  }
  0x75   :  { %1817 = vmatprep.subr.bf16.mxu0 %v2571_v34  ;;  %1981 = vmatprep.subr.bf16.mxu1 %v2574_v35  ;;  %v2643_v34 = vld [vmem:[#allocation2 + $0x404] ss:$16 sps:$4 sm:$0xff]   ;;  %v161_v35 = vpack.c.bf16 %v130_v28, %v130_v28  ;;  %v2707_v28 = vld [vmem:[#allocation2 + $0x560] ss:$16 sps:$4 sm:$0xff]  }
  0x77   :  { %v210_v9 = vunpack.c.l.b16 %v161_v35  ;;  %v2724_v35 = vld [vmem:[#allocation2 + $0x5ac] ss:$16 sps:$4 sm:$0xff]  }
  0x78   :  { %1818 = vmatpush1.bf16.msra.mxu0 %v2569_v36  ;;  %1982 = vmatpush1.bf16.msra.mxu1 %v2572_v37  ;;  %v2646_v36 = vld [vmem:[#allocation2 + $0x40c] ss:$16 sps:$4 sm:$0xff]   ;;  %v211_v37 = vunpack.c.l.b16 %v162_v32  ;;  %v2713_v32 = vld [vmem:[#allocation2 + $0x580] ss:$16 sps:$4 sm:$0xff]  }
  0x79   :  { %1819 = vmatprep.subr.bf16.mxu0 %v2577_v38  ;;  %1983 = vmatprep.subr.bf16.mxu1 %v2580_v39  ;;  %v222_v38 = vrot.slane %v215_v33, 7  ;;  %v220_v39 = vrot.slane %v214_v14, 7  ;;  %v2716_v33 = vld [vmem:[#allocation2 + $0x588] ss:$16 sps:$4 sm:$0xff]   ;;  %v2719_v14 = vld [vmem:[#allocation2 + $0x5a0] ss:$16 sps:$4 sm:$0xff]  }
  0x7b   :  { %v3023_v15 = vsel %vm184_vm0, %v222_v38, %v211_v37  ;;  %v2727_v37 = vld [vmem:[#allocation2 + $0x5c4] ss:$16 sps:$4 sm:$0xff]   ;;  %v2730_v38 = vld [vmem:[#allocation2 + $0x5cc] ss:$16 sps:$4 sm:$0xff]  }
  0x7c   :  { %1820 = vmatpush1.bf16.msra.mxu0 %v2575_v40  ;;  %1984 = vmatpush1.bf16.msra.mxu1 %v2578_v41  ;;  %v2641_v40 = vld [vmem:[#allocation2 + $0x400] ss:$16 sps:$4 sm:$0xff]   ;;  %v2644_v41 = vld [vmem:[#allocation2 + $0x408] ss:$16 sps:$4 sm:$0xff]  }
  0x7d   :  { %1821 = vmatprep.subr.bf16.mxu0 %v2583_v42  ;;  %1985 = vmatprep.subr.bf16.mxu1 %v2586_v44  ;;  %v2649_v42 = vld [vmem:[#allocation2 + $0x424] ss:$16 sps:$4 sm:$0xff]   ;;  %v3026_v44 = vsel %vm184_vm0, %v220_v39, %v210_v9  ;;  %v2725_v9 = vld [vmem:[#allocation2 + $0x5c0] ss:$16 sps:$4 sm:$0xff]   ;;  %v2728_v39 = vld [vmem:[#allocation2 + $0x5c8] ss:$16 sps:$4 sm:$0xff]  }
  0x80   :  { %1822 = vmatpush1.bf16.msra.mxu0 %v2581_v45  ;;  %1986 = vmatpush1.bf16.msra.mxu1 %v2584_v46  ;;  %v2652_v45 = vld [vmem:[#allocation2 + $0x42c] ss:$16 sps:$4 sm:$0xff]   ;;  %v225_v46 = vpack.c.b16 %v3007_v20, %v3007_v20 }
  0x81   :  { %1823 = vmatprep.subr.bf16.mxu0 %v2589_v47  ;;  %1987 = vmatprep.subr.bf16.mxu1 %v2592_v48  ;;  %v2647_v47 = vld [vmem:[#allocation2 + $0x420] ss:$16 sps:$4 sm:$0xff]   ;;  %v2650_v48 = vld [vmem:[#allocation2 + $0x428] ss:$16 sps:$4 sm:$0xff]   ;;  %v2664_v20 = vld [vmem:[#allocation2 + $0x46c] ss:$16 sps:$4 sm:$0xff]  }
  0x84   :  { %1824 = vmatpush1.bf16.msra.mxu0 %v2587_v49  ;;  %1988 = vmatpush1.bf16.msra.mxu1 %v2590_v51  ;;  %v2658_v49 = vld [vmem:[#allocation2 + $0x44c] ss:$16 sps:$4 sm:$0xff]   ;;  %v2653_v51 = vld [vmem:[#allocation2 + $0x440] ss:$16 sps:$4 sm:$0xff]  }
  0x85   :  { %1825 = vmatprep.subr.bf16.mxu0 %v2595_v52  ;;  %1989 = vmatprep.subr.bf16.mxu1 %v2598_v53  ;;  %v2656_v52 = vld [vmem:[#allocation2 + $0x448] ss:$16 sps:$4 sm:$0xff]   ;;  %v2661_v53 = vld [vmem:[#allocation2 + $0x464] ss:$16 sps:$4 sm:$0xff]  }
  0x88   :  { %1826 = vmatpush1.bf16.msra.mxu0 %v2593_v54  ;;  %1990 = vmatpush1.bf16.msra.mxu1 %v2596_v55  ;;  %v2659_v54 = vld [vmem:[#allocation2 + $0x460] ss:$16 sps:$4 sm:$0xff]   ;;  %v2662_v55 = vld [vmem:[#allocation2 + $0x468] ss:$16 sps:$4 sm:$0xff]  }
  0x89   :  { %1827 = vmatprep.subr.bf16.mxu0 %v2601_v56  ;;  %1991 = vmatprep.subr.bf16.mxu1 %v2604_v57  ;;  %v2667_v56 = vld [vmem:[#allocation2 + $0x484] ss:$16 sps:$4 sm:$0xff]   ;;  %v2670_v57 = vld [vmem:[#allocation2 + $0x48c] ss:$16 sps:$4 sm:$0xff]  }
  0x8c   :  { %1828 = vmatpush1.bf16.msra.mxu0 %v2599_v58  ;;  %1992 = vmatpush1.bf16.msra.mxu1 %v2602_v59  ;;  %v2665_v58 = vld [vmem:[#allocation2 + $0x480] ss:$16 sps:$4 sm:$0xff]   ;;  %v2668_v59 = vld [vmem:[#allocation2 + $0x488] ss:$16 sps:$4 sm:$0xff]  }
  0x8d   :  { %1829 = vmatprep.subr.bf16.mxu0 %v2607_v60  ;;  %1993 = vmatprep.subr.bf16.mxu1 %v2610_v61  ;;  %v2673_v60 = vld [vmem:[#allocation2 + $0x4a4] ss:$16 sps:$4 sm:$0xff]   ;;  %v2676_v61 = vld [vmem:[#allocation2 + $0x4ac] ss:$16 sps:$4 sm:$0xff]  }
  0x90   :  { %1830 = vmatpush1.bf16.msra.mxu0 %v2605_v62  ;;  %1994 = vmatpush1.bf16.msra.mxu1 %v2608_v63  ;;  %v2671_v62 = vld [vmem:[#allocation2 + $0x4a0] ss:$16 sps:$4 sm:$0xff]   ;;  %v2674_v63 = vld [vmem:[#allocation2 + $0x4a8] ss:$16 sps:$4 sm:$0xff]  }
  0x91   :  { %1831 = vmatprep.subr.bf16.mxu0 %v2613_v0  ;;  %1995 = vmatprep.subr.bf16.mxu1 %v2616_v1  ;;  %v2679_v0 = vld [vmem:[#allocation2 + $0x4c4] ss:$16 sps:$4 sm:$0xff]   ;;  %v2682_v1 = vld [vmem:[#allocation2 + $0x4cc] ss:$16 sps:$4 sm:$0xff]  }
  0x94   :  { %1832 = vmatpush1.bf16.msra.mxu0 %v2611_v50  ;;  %1996 = vmatpush1.bf16.msra.mxu1 %v2614_v2  ;;  %v2677_v50 = vld [vmem:[#allocation2 + $0x4c0] ss:$16 sps:$4 sm:$0xff]   ;;  %v2680_v2 = vld [vmem:[#allocation2 + $0x4c8] ss:$16 sps:$4 sm:$0xff]  }
  0x95   :  { %1833 = vmatprep.subr.bf16.mxu0 %v2619_v3  ;;  %1997 = vmatprep.subr.bf16.mxu1 %v2622_v5  ;;  %v2685_v3 = vld [vmem:[#allocation2 + $0x4e4] ss:$16 sps:$4 sm:$0xff]   ;;  %v2688_v5 = vld [vmem:[#allocation2 + $0x4ec] ss:$16 sps:$4 sm:$0xff]  }
  0x98   :  { %1834 = vmatpush1.bf16.msra.mxu0 %v2617_v6  ;;  %1998 = vmatpush1.bf16.msra.mxu1 %v2620_v7  ;;  %v2683_v6 = vld [vmem:[#allocation2 + $0x4e0] ss:$16 sps:$4 sm:$0xff]   ;;  %v2686_v7 = vld [vmem:[#allocation2 + $0x4e8] ss:$16 sps:$4 sm:$0xff]  }
  0x99   :  { %1835 = vmatprep.subr.bf16.mxu0 %v2625_v8  ;;  %1999 = vmatprep.subr.bf16.mxu1 %v2628_v10  ;;  %v2691_v8 = vld [vmem:[#allocation2 + $0x504] ss:$16 sps:$4 sm:$0xff]   ;;  %v2694_v10 = vld [vmem:[#allocation2 + $0x50c] ss:$16 sps:$4 sm:$0xff]  }
  0x9c   :  { %1836 = vmatpush1.bf16.msra.mxu0 %v2623_v11  ;;  %2000 = vmatpush1.bf16.msra.mxu1 %v2626_v12  ;;  %v2689_v11 = vld [vmem:[#allocation2 + $0x500] ss:$16 sps:$4 sm:$0xff]   ;;  %v2692_v12 = vld [vmem:[#allocation2 + $0x508] ss:$16 sps:$4 sm:$0xff]  }
  0x9d   :  { %1837 = vmatprep.subr.bf16.mxu0 %v2631_v16  ;;  %2001 = vmatprep.subr.bf16.mxu1 %v2634_v17  ;;  %v2697_v16 = vld [vmem:[#allocation2 + $0x524] ss:$16 sps:$4 sm:$0xff]   ;;  %v2700_v17 = vld [vmem:[#allocation2 + $0x52c] ss:$16 sps:$4 sm:$0xff]  }
  0xa0   :  { %1838 = vmatpush1.bf16.msra.mxu0 %v2629_v18  ;;  %2002 = vmatpush1.bf16.msra.mxu1 %v2632_v19  ;;  %v2695_v18 = vld [vmem:[#allocation2 + $0x520] ss:$16 sps:$4 sm:$0xff]   ;;  %v2698_v19 = vld [vmem:[#allocation2 + $0x528] ss:$16 sps:$4 sm:$0xff]  }
  0xa1   :  { %1839 = vmatprep.subr.bf16.mxu0 %v2637_v22  ;;  %2003 = vmatprep.subr.bf16.mxu1 %v2640_v24  ;;  %v2706_v22 = vld [vmem:[#allocation2 + $0x54c] ss:$16 sps:$4 sm:$0xff]   ;;  %v2704_v24 = vld [vmem:[#allocation2 + $0x548] ss:$16 sps:$4 sm:$0xff]  }
  0xa4   :  { %1840 = vmatpush1.bf16.msra.mxu0 %v2635_v30  ;;  %2004 = vmatpush1.bf16.msra.mxu1 %v2638_v31  ;;  %v2715_v30 = vld [vmem:[#allocation2 + $0x584] ss:$16 sps:$4 sm:$0xff]   ;;  %v2718_v31 = vld [vmem:[#allocation2 + $0x58c] ss:$16 sps:$4 sm:$0xff]  }
  0xa5   :  { %1850 = vmatprep.subr.bf16.mxu0 %v2643_v34  ;;  %2014 = vmatprep.subr.bf16.mxu1 %v2646_v36  ;;  %v2721_v34 = vld [vmem:[#allocation2 + $0x5a4] ss:$16 sps:$4 sm:$0xff]   ;;  %v2722_v36 = vld [vmem:[#allocation2 + $0x5a8] ss:$16 sps:$4 sm:$0xff]  }
  0xa7   :  { %1842 = vmatmul.mubr.bf16.vlgmr.msra.gmra.mrb[0].mxu0 %v194_v13  ;;  %2006 = vmatmul.mubr.bf16.vlgmr.msra.gmra.mrb[0].mxu1 %v194_v13  ;;  %v2731_v13 = vld [vmem:[#allocation2 + $0x5e0] ss:$16 sps:$4 sm:$0xff]  }
  0xa8   :  { %1851 = vmatpush1.bf16.msra.mxu0 %v2641_v40  ;;  %2015 = vmatpush1.bf16.msra.mxu1 %v2644_v41  ;;  %v2733_v40 = vld [vmem:[#allocation2 + $0x5e4] ss:$16 sps:$4 sm:$0xff]   ;;  %v2736_v41 = vld [vmem:[#allocation2 + $0x5ec] ss:$16 sps:$4 sm:$0xff]  }
  0xa9   :  { %1852 = vmatprep.subr.bf16.mxu0 %v2649_v42  ;;  %2016 = vmatprep.subr.bf16.mxu1 %v2652_v45  ;;  %v2734_v42 = vld [vmem:[#allocation2 + $0x5e8] ss:$16 sps:$4 sm:$0xff]   ;;  %v2739_v45 = vld [vmem:[#allocation2 + $0x604] ss:$16 sps:$4 sm:$0xff]  }
  0xaa   :  { %1882 = vmatprep.mubr.bf16.mxu0 %v225_v46  ;;  %2046 = vmatprep.mubr.bf16.mxu1 %v225_v46  ;;  %v2742_v46 = vld [vmem:[#allocation2 + $0x60c] ss:$16 sps:$4 sm:$0xff]  }
  0xac   :  { %1853 = vmatpush1.bf16.msra.mxu0 %v2647_v47  ;;  %2017 = vmatpush1.bf16.msra.mxu1 %v2650_v48  ;;  %v224_v47 = vpack.c.b16 %v3010_v26, %v3010_v26  ;;  %v2737_v48 = vld [vmem:[#allocation2 + $0x600] ss:$16 sps:$4 sm:$0xff]   ;;  %v2751_v26 = vld [vmem:[#allocation2 + $0x644] ss:$16 sps:$4 sm:$0xff]  }
  0xad   :  { %1854 = vmatprep.subr.bf16.mxu0 %v2655_v4  ;;  %2018 = vmatprep.subr.bf16.mxu1 %v2658_v49  ;;  %v2740_v4 = vld [vmem:[#allocation2 + $0x608] ss:$16 sps:$4 sm:$0xff]   ;;  %v2745_v49 = vld [vmem:[#allocation2 + $0x624] ss:$16 sps:$4 sm:$0xff]  }
  0xb0   :  { %1855 = vmatpush1.bf16.msra.mxu0 %v2653_v51  ;;  %2019 = vmatpush1.bf16.msra.mxu1 %v2656_v52  ;;  %v2748_v51 = vld [vmem:[#allocation2 + $0x62c] ss:$16 sps:$4 sm:$0xff]   ;;  %v227_v52 = vpack.c.b16 %v3023_v15, %v3023_v15 }
  0xb1   :  { %1856 = vmatprep.subr.bf16.mxu0 %v2661_v53  ;;  %2020 = vmatprep.subr.bf16.mxu1 %v2664_v20  ;;  %v2743_v53 = vld [vmem:[#allocation2 + $0x620] ss:$16 sps:$4 sm:$0xff]   ;;  %v2746_v20 = vld [vmem:[#allocation2 + $0x628] ss:$16 sps:$4 sm:$0xff]   ;;  %v2760_v15 = vld [vmem:[#allocation2 + $0x66c] ss:$16 sps:$4 sm:$0xff]  }
  0xb4   :  { %1857 = vmatpush1.bf16.msra.mxu0 %v2659_v54  ;;  %2021 = vmatpush1.bf16.msra.mxu1 %v2662_v55  ;;  %v2754_v54 = vld [vmem:[#allocation2 + $0x64c] ss:$16 sps:$4 sm:$0xff]   ;;  %v2749_v55 = vld [vmem:[#allocation2 + $0x640] ss:$16 sps:$4 sm:$0xff]  }
  0xb5   :  { %1858 = vmatprep.subr.bf16.mxu0 %v2667_v56  ;;  %2022 = vmatprep.subr.bf16.mxu1 %v2670_v57  ;;  %v2752_v56 = vld [vmem:[#allocation2 + $0x648] ss:$16 sps:$4 sm:$0xff]   ;;  %v2757_v57 = vld [vmem:[#allocation2 + $0x664] ss:$16 sps:$4 sm:$0xff]  }
  0xb8   :  { %1859 = vmatpush1.bf16.msra.mxu0 %v2665_v58  ;;  %2023 = vmatpush1.bf16.msra.mxu1 %v2668_v59  ;;  %v2755_v58 = vld [vmem:[#allocation2 + $0x660] ss:$16 sps:$4 sm:$0xff]   ;;  %v2758_v59 = vld [vmem:[#allocation2 + $0x668] ss:$16 sps:$4 sm:$0xff]  }
  0xb9   :  { %1860 = vmatprep.subr.bf16.mxu0 %v2673_v60  ;;  %2024 = vmatprep.subr.bf16.mxu1 %v2676_v61  ;;  %v2763_v60 = vld [vmem:[#allocation2 + $0x684] ss:$16 sps:$4 sm:$0xff]   ;;  %v2766_v61 = vld [vmem:[#allocation2 + $0x68c] ss:$16 sps:$4 sm:$0xff]  }
  0xbc   :  { %1861 = vmatpush1.bf16.msra.mxu0 %v2671_v62  ;;  %2025 = vmatpush1.bf16.msra.mxu1 %v2674_v63  ;;  %v2761_v62 = vld [vmem:[#allocation2 + $0x680] ss:$16 sps:$4 sm:$0xff]   ;;  %v2764_v63 = vld [vmem:[#allocation2 + $0x688] ss:$16 sps:$4 sm:$0xff]  }
  0xbd   :  { %1862 = vmatprep.subr.bf16.mxu0 %v2679_v0  ;;  %2026 = vmatprep.subr.bf16.mxu1 %v2682_v1  ;;  %v2769_v0 = vld [vmem:[#allocation2 + $0x6a4] ss:$16 sps:$4 sm:$0xff]   ;;  %v2772_v1 = vld [vmem:[#allocation2 + $0x6ac] ss:$16 sps:$4 sm:$0xff]  }
  0xc0   :  { %1863 = vmatpush1.bf16.msra.mxu0 %v2677_v50  ;;  %2027 = vmatpush1.bf16.msra.mxu1 %v2680_v2  ;;  %v2767_v50 = vld [vmem:[#allocation2 + $0x6a0] ss:$16 sps:$4 sm:$0xff]   ;;  %v2770_v2 = vld [vmem:[#allocation2 + $0x6a8] ss:$16 sps:$4 sm:$0xff]  }
  0xc1   :  { %1864 = vmatprep.subr.bf16.mxu0 %v2685_v3  ;;  %2028 = vmatprep.subr.bf16.mxu1 %v2688_v5  ;;  %v2775_v3 = vld [vmem:[#allocation2 + $0x6c4] ss:$16 sps:$4 sm:$0xff]   ;;  %v2778_v5 = vld [vmem:[#allocation2 + $0x6cc] ss:$16 sps:$4 sm:$0xff]  }
  0xc4   :  { %1865 = vmatpush1.bf16.msra.mxu0 %v2683_v6  ;;  %2029 = vmatpush1.bf16.msra.mxu1 %v2686_v7  ;;  %v2773_v6 = vld [vmem:[#allocation2 + $0x6c0] ss:$16 sps:$4 sm:$0xff]   ;;  %v2776_v7 = vld [vmem:[#allocation2 + $0x6c8] ss:$16 sps:$4 sm:$0xff]  }
  0xc5   :  { %1866 = vmatprep.subr.bf16.mxu0 %v2691_v8  ;;  %2030 = vmatprep.subr.bf16.mxu1 %v2694_v10  ;;  %v2781_v8 = vld [vmem:[#allocation2 + $0x6e4] ss:$16 sps:$4 sm:$0xff]   ;;  %v2784_v10 = vld [vmem:[#allocation2 + $0x6ec] ss:$16 sps:$4 sm:$0xff]  }
  0xc8   :  { %1867 = vmatpush1.bf16.msra.mxu0 %v2689_v11  ;;  %2031 = vmatpush1.bf16.msra.mxu1 %v2692_v12  ;;  %v2779_v11 = vld [vmem:[#allocation2 + $0x6e0] ss:$16 sps:$4 sm:$0xff]   ;;  %v2782_v12 = vld [vmem:[#allocation2 + $0x6e8] ss:$16 sps:$4 sm:$0xff]  }
  0xc9   :  { %1868 = vmatprep.subr.bf16.mxu0 %v2697_v16  ;;  %2032 = vmatprep.subr.bf16.mxu1 %v2700_v17  ;;  %v2787_v16 = vld [vmem:[#allocation2 + $0x704] ss:$16 sps:$4 sm:$0xff]   ;;  %v2790_v17 = vld [vmem:[#allocation2 + $0x70c] ss:$16 sps:$4 sm:$0xff]  }
  0xcc   :  { %1869 = vmatpush1.bf16.msra.mxu0 %v2695_v18  ;;  %2033 = vmatpush1.bf16.msra.mxu1 %v2698_v19  ;;  %v2785_v18 = vld [vmem:[#allocation2 + $0x700] ss:$16 sps:$4 sm:$0xff]   ;;  %v2788_v19 = vld [vmem:[#allocation2 + $0x708] ss:$16 sps:$4 sm:$0xff]  }
  0xcd   :  { %1870 = vmatprep.subr.bf16.mxu0 %v2703_v21  ;;  %2034 = vmatprep.subr.bf16.mxu1 %v2706_v22  ;;  %v2793_v21 = vld [vmem:[#allocation2 + $0x724] ss:$16 sps:$4 sm:$0xff]   ;;  %v2796_v22 = vld [vmem:[#allocation2 + $0x72c] ss:$16 sps:$4 sm:$0xff]  }
  0xd0   :  { %1871 = vmatpush1.bf16.msra.mxu0 %v2701_v23  ;;  %2035 = vmatpush1.bf16.msra.mxu1 %v2704_v24  ;;  %v2791_v23 = vld [vmem:[#allocation2 + $0x720] ss:$16 sps:$4 sm:$0xff]   ;;  %v2794_v24 = vld [vmem:[#allocation2 + $0x728] ss:$16 sps:$4 sm:$0xff]  }
  0xd1   :  { %1872 = vmatprep.subr.bf16.mxu0 %v2709_v25  ;;  %2036 = vmatprep.subr.bf16.mxu1 %v2712_v27  ;;  %v2799_v25 = vld [vmem:[#allocation2 + $0x744] ss:$16 sps:$4 sm:$0xff]   ;;  %v2802_v27 = vld [vmem:[#allocation2 + $0x74c] ss:$16 sps:$4 sm:$0xff]  }
  0xd4   :  { %1873 = vmatpush1.bf16.msra.mxu0 %v2707_v28  ;;  %2037 = vmatpush1.bf16.msra.mxu1 %v2710_v29  ;;  %v2797_v28 = vld [vmem:[#allocation2 + $0x740] ss:$16 sps:$4 sm:$0xff]   ;;  %v2800_v29 = vld [vmem:[#allocation2 + $0x748] ss:$16 sps:$4 sm:$0xff]  }
  0xd5   :  { %1874 = vmatprep.subr.bf16.mxu0 %v2715_v30  ;;  %2038 = vmatprep.subr.bf16.mxu1 %v2718_v31  ;;  %v2805_v30 = vld [vmem:[#allocation2 + $0x764] ss:$16 sps:$4 sm:$0xff]   ;;  %v2808_v31 = vld [vmem:[#allocation2 + $0x76c] ss:$16 sps:$4 sm:$0xff]  }
  0xd8   :  { %1875 = vmatpush1.bf16.msra.mxu0 %v2713_v32  ;;  %2039 = vmatpush1.bf16.msra.mxu1 %v2716_v33  ;;  %v2803_v32 = vld [vmem:[#allocation2 + $0x760] ss:$16 sps:$4 sm:$0xff]   ;;  %v2806_v33 = vld [vmem:[#allocation2 + $0x768] ss:$16 sps:$4 sm:$0xff]  }
  0xd9   :  { %1876 = vmatprep.subr.bf16.mxu0 %v2721_v34  ;;  %2040 = vmatprep.subr.bf16.mxu1 %v2724_v35  ;;  %v2811_v34 = vld [vmem:[#allocation2 + $0x784] ss:$16 sps:$4 sm:$0xff]   ;;  %v2814_v35 = vld [vmem:[#allocation2 + $0x78c] ss:$16 sps:$4 sm:$0xff]  }
  0xdc   :  { %1877 = vmatpush1.bf16.msra.mxu0 %v2719_v14  ;;  %2041 = vmatpush1.bf16.msra.mxu1 %v2722_v36  ;;  %v2809_v14 = vld [vmem:[#allocation2 + $0x780] ss:$16 sps:$4 sm:$0xff]   ;;  %v2812_v36 = vld [vmem:[#allocation2 + $0x788] ss:$16 sps:$4 sm:$0xff]  }
  0xdd   :  { %1878 = vmatprep.subr.bf16.mxu0 %v2727_v37  ;;  %2042 = vmatprep.subr.bf16.mxu1 %v2730_v38  ;;  %v2817_v37 = vld [vmem:[#allocation2 + $0x7a4] ss:$16 sps:$4 sm:$0xff]   ;;  %v2820_v38 = vld [vmem:[#allocation2 + $0x7ac] ss:$16 sps:$4 sm:$0xff]  }
  0xe0   :  { %1879 = vmatpush1.bf16.msra.mxu0 %v2725_v9  ;;  %2043 = vmatpush1.bf16.msra.mxu1 %v2728_v39  ;;  %v2815_v9 = vld [vmem:[#allocation2 + $0x7a0] ss:$16 sps:$4 sm:$0xff]   ;;  %v2818_v39 = vld [vmem:[#allocation2 + $0x7a8] ss:$16 sps:$4 sm:$0xff]  }
  0xe1   :  { %1880 = vmatprep.subr.bf16.mxu0 %v2733_v40  ;;  %2044 = vmatprep.subr.bf16.mxu1 %v2736_v41  ;;  %v2823_v40 = vld [vmem:[#allocation2 + $0x7c4] ss:$16 sps:$4 sm:$0xff]   ;;  %v2826_v41 = vld [vmem:[#allocation2 + $0x7cc] ss:$16 sps:$4 sm:$0xff]  }
  0xe4   :  { %1881 = vmatpush1.bf16.msra.mxu0 %v2731_v13  ;;  %2045 = vmatpush1.bf16.msra.mxu1 %v2734_v42  ;;  %v2821_v13 = vld [vmem:[#allocation2 + $0x7c0] ss:$16 sps:$4 sm:$0xff]   ;;  %v2824_v42 = vld [vmem:[#allocation2 + $0x7c8] ss:$16 sps:$4 sm:$0xff]  }
  0xe5   :  { %1891 = vmatprep.subr.bf16.mxu0 %v2739_v45  ;;  %2055 = vmatprep.subr.bf16.mxu1 %v2742_v46  ;;  %v2829_v45 = vld [vmem:[#allocation2 + $0x7e4] ss:$16 sps:$4 sm:$0xff]   ;;  %v2832_v46 = vld [vmem:[#allocation2 + $0x7ec] ss:$16 sps:$4 sm:$0xff]  }
  0xe7   :  { %1883 = vmatmul.mubr.bf16.vlgmr.msra.gmra.mrb[0].mxu0 %v224_v47  ;;  %2047 = vmatmul.mubr.bf16.vlgmr.msra.gmra.mrb[0].mxu1 %v224_v47  ;;  %v2827_v47 = vld [vmem:[#allocation2 + $0x7e0] ss:$16 sps:$4 sm:$0xff]  }
  0xe8   :  { %1892 = vmatpush1.bf16.msra.mxu0 %v2737_v48  ;;  %2056 = vmatpush1.bf16.msra.mxu1 %v2740_v4  ;;  %v2830_v48 = vld [vmem:[#allocation2 + $0x7e8] ss:$16 sps:$4 sm:$0xff]   ;;  %v226_v4 = vpack.c.b16 %v3026_v44, %v3026_v44 }
  0xe9   :  { %1893 = vmatprep.subr.bf16.mxu0 %v2745_v49  ;;  %2057 = vmatprep.subr.bf16.mxu1 %v2748_v51 }
  0xea   :  { %1923 = vmatprep.mubr.bf16.mxu0 %v227_v52  ;;  %2087 = vmatprep.mubr.bf16.mxu1 %v227_v52 }
  0xec   :  { %1894 = vmatpush1.bf16.msra.mxu0 %v2743_v53  ;;  %2058 = vmatpush1.bf16.msra.mxu1 %v2746_v20 }
  0xed   :  { %1895 = vmatprep.subr.bf16.mxu0 %v2751_v26  ;;  %2059 = vmatprep.subr.bf16.mxu1 %v2754_v54 }
  0xf0   :  { %1896 = vmatpush1.bf16.msra.mxu0 %v2749_v55  ;;  %2060 = vmatpush1.bf16.msra.mxu1 %v2752_v56 }
  0xf1   :  { %1897 = vmatprep.subr.bf16.mxu0 %v2757_v57  ;;  %2061 = vmatprep.subr.bf16.mxu1 %v2760_v15 }
  0xf4   :  { %1898 = vmatpush1.bf16.msra.mxu0 %v2755_v58  ;;  %2062 = vmatpush1.bf16.msra.mxu1 %v2758_v59 }
  0xf5   :  { %1899 = vmatprep.subr.bf16.mxu0 %v2763_v60  ;;  %2063 = vmatprep.subr.bf16.mxu1 %v2766_v61 }
  0xf8   :  { %1900 = vmatpush1.bf16.msra.mxu0 %v2761_v62  ;;  %2064 = vmatpush1.bf16.msra.mxu1 %v2764_v63 }
  0xf9   :  { %1901 = vmatprep.subr.bf16.mxu0 %v2769_v0  ;;  %2065 = vmatprep.subr.bf16.mxu1 %v2772_v1 }
  0xfc   :  { %1902 = vmatpush1.bf16.msra.mxu0 %v2767_v50  ;;  %2066 = vmatpush1.bf16.msra.mxu1 %v2770_v2  ;;  %v2925_v50 = vmov 1983009808  }
  0xfd   :  { %1903 = vmatprep.subr.bf16.mxu0 %v2775_v3  ;;  %2067 = vmatprep.subr.bf16.mxu1 %v2778_v5  ;;  %v2127_v2 = vunpack.c.l.s4 %v2925_v50 }
  0xff   :  { %v2128_v3 = vunpack.c.0.s8 %v2127_v2 }
 0x100   :  { %1904 = vmatpush1.bf16.msra.mxu0 %v2773_v6  ;;  %2068 = vmatpush1.bf16.msra.mxu1 %v2776_v7 }
 0x101   :  { %1905 = vmatprep.subr.bf16.mxu0 %v2781_v8  ;;  %2069 = vmatprep.subr.bf16.mxu1 %v2784_v10  ;;  %v2131_v7 = vsub.s32 %v2128_v3, %v2966_v43 }
 0x104   :  { %1906 = vmatpush1.bf16.msra.mxu0 %v2779_v11  ;;  %2070 = vmatpush1.bf16.msra.mxu1 %v2782_v12 }
 0x105   :  { %1907 = vmatprep.subr.bf16.mxu0 %v2787_v16  ;;  %2071 = vmatprep.subr.bf16.mxu1 %v2790_v17 }
 0x108   :  { %1908 = vmatpush1.bf16.msra.mxu0 %v2785_v18  ;;  %2072 = vmatpush1.bf16.msra.mxu1 %v2788_v19 }
 0x109   :  { %1909 = vmatprep.subr.bf16.mxu0 %v2793_v21  ;;  %2073 = vmatprep.subr.bf16.mxu1 %v2796_v22 }
 0x10c   :  { %1910 = vmatpush1.bf16.msra.mxu0 %v2791_v23  ;;  %2074 = vmatpush1.bf16.msra.mxu1 %v2794_v24 }
 0x10d   :  { %1911 = vmatprep.subr.bf16.mxu0 %v2799_v25  ;;  %2075 = vmatprep.subr.bf16.mxu1 %v2802_v27 }
 0x110   :  { %1912 = vmatpush1.bf16.msra.mxu0 %v2797_v28  ;;  %2076 = vmatpush1.bf16.msra.mxu1 %v2800_v29 }
 0x111   :  { %1913 = vmatprep.subr.bf16.mxu0 %v2805_v30  ;;  %2077 = vmatprep.subr.bf16.mxu1 %v2808_v31 }
 0x114   :  { %1914 = vmatpush1.bf16.msra.mxu0 %v2803_v32  ;;  %2078 = vmatpush1.bf16.msra.mxu1 %v2806_v33 }
 0x115   :  { %1915 = vmatprep.subr.bf16.mxu0 %v2811_v34  ;;  %2079 = vmatprep.subr.bf16.mxu1 %v2814_v35 }
 0x118   :  { %1916 = vmatpush1.bf16.msra.mxu0 %v2809_v14  ;;  %2080 = vmatpush1.bf16.msra.mxu1 %v2812_v36 }
 0x119   :  { %1917 = vmatprep.subr.bf16.mxu0 %v2817_v37  ;;  %2081 = vmatprep.subr.bf16.mxu1 %v2820_v38 }
 0x11c   :  { %1918 = vmatpush1.bf16.msra.mxu0 %v2815_v9  ;;  %2082 = vmatpush1.bf16.msra.mxu1 %v2818_v39 }
 0x11d   :  { %1919 = vmatprep.subr.bf16.mxu0 %v2823_v40  ;;  %2083 = vmatprep.subr.bf16.mxu1 %v2826_v41 }
 0x120   :  { %1920 = vmatpush1.bf16.msra.mxu0 %v2821_v13  ;;  %2084 = vmatpush1.bf16.msra.mxu1 %v2824_v42 }
 0x121   :  { %1921 = vmatprep.subr.bf16.mxu0 %v2829_v45  ;;  %2085 = vmatprep.subr.bf16.mxu1 %v2832_v46 }
 0x124   :  { %1922 = vmatpush1.bf16.msra.mxu0 %v2827_v47  ;;  %2086 = vmatpush1.bf16.msra.mxu1 %v2830_v48 }
 0x127   :  { %1924 = vmatmul.mubr.bf16.vlgmr.msra.gmra.mrb[0].mxu0 %v226_v4  ;;  %2088 = vmatmul.mubr.bf16.vlgmr.msra.gmra.mrb[0].mxu1 %v226_v4 }
 0x1fa   :  { %v1925_v49 = vpop.f32.mrb[0].mxu0  ;;  %v2089_v51 = vpop.f32.mrb[0].mxu1 }
 0x1fb   :  { %v2415_v52 = vmul.f32 -1.442695, %v1925_v49  ;;  %v2417_v53 = vmul.f32 -1.442695, %v2089_v51  ;;  %v1927_v20 = vpop.f32.mrb[1].mxu0  ;;  %v2091_v26 = vpop.f32.mrb[1].mxu1 }
 0x1fc   :  { %v2416_v54 = vmul.f32 -1.442695, %v1927_v20  ;;  %v2418_v55 = vmul.f32 -1.442695, %v2091_v26  ;;  %v1929_v56 = vpop.f32.mrb[2].mxu0  ;;  %v2093_v57 = vpop.f32.mrb[2].mxu1 }
 0x1fd   :  { %2833 = vpow2.f32 %v2415_v52  ;;  %v1930_v15 = vpop.f32.mrb[3].mxu0  ;;  %v2094_v58 = vpop.f32.mrb[3].mxu1 }
 0x1fe   :  { %2835 = vpow2.f32 %v2417_v53 }
 0x1ff   :  { %2837 = vpow2.f32 %v2416_v54 }
 0x200   :  { %2839 = vpow2.f32 %v2418_v55 }
 0x207   :  { %v2834_v44 = vpop.eup %2833 }
 0x208   :  { %v2836_v59 = vpop.eup %2835  ;;  %v2108_v60 = vadd.f32 1.0, %v2834_v44 }
 0x209   :  { %v2838_v61 = vpop.eup %2837  ;;  %v2110_v62 = vadd.f32 1.0, %v2836_v59 }
 0x20a   :  { %v2840_v63 = vpop.eup %2839  ;;  %2841 = vrcp.f32 %v2108_v60  ;;  %v2109_v0 = vadd.f32 1.0, %v2838_v61 }
 0x20b   :  { %2843 = vrcp.f32 %v2110_v62  ;;  %v2111_v1 = vadd.f32 1.0, %v2840_v63 }
 0x20c   :  { %2845 = vrcp.f32 %v2109_v0 }
 0x20d   :  { %2847 = vrcp.f32 %v2111_v1 }
 0x214   :  { %v2842_v5 = vpop.eup %2841 }
 0x215   :  { %v2844_v6 = vpop.eup %2843 }
 0x216   :  { %v2846_v8 = vpop.eup %2845 }
 0x217   :  { %v2848_v10 = vpop.eup %2847  ;;  %v2124_v11 = vcombine.low %v2842_v5, %v2846_v8 }
 0x218   :  { %v2125_v12 = vcombine.low %v2844_v6, %v2848_v10 }
 0x219   :  { %v2132_v16 = vrot.slane %v2124_v11, %v2131_v7 }
 0x21a   :  { %v2139_v17 = vrot.slane %v2125_v12, %v2131_v7 }
 0x21c   :  { %v2140_v18 = vcombine.low %v2132_v16, %v2139_v17 }
 0x21e   :  { %2142 = vst [vmem:[#allocation7] sm:$0xff] %v2140_v18 }
 0x21f   :  { %2904 = shalt.err (!%p2901_p6)
}
 0x220   :  { %s2905_s10 = scalar_lea.hbm %s3051_s2, 128 }
 0x221   :  { %p2906_p7 = scmp.ne.s32.totalorder %s3051_s2, %s2905_s10  ;;  %p2909_p8 = scmp.lt.u32.totalorder %s2905_s10, %s3051_s2 }
 0x223   :  { %p2911_p9 = pnand %p2909_p8, %p2906_p7 }
 0x225   :  { %2914 = shalt.err (!%p2911_p9)
}
 0x226   :  { %2152 = dma.vmem_to_hbm [thread:$0]  %s2150_s6, 128, %s3051_s2, [#allocation4]  }
 0x227   :  { %2919 = dma.done.wait [#allocation4], 128  }
 0x228   :  { %2920 = vsyncadd [#allocation4], 4294967168 }
 0x229   :  { %2156 = vsyncpa [#allocation3], 1 }
 0x22a   :  { %2157 = vsyncpa [#allocation6], 1 }
 0x22b   :  { %2158 = vsyncpa [#allocation4], 1 }

</bundles_post_ra>
